<compile_context>
chip_gen: v7x
topology: tpu7x:2x2x1
jax: 0.10.0
libtpu: 0.0.40
codegen_flags: <defaults>
</compile_context>

<pallas_src>
import jax
import jax.numpy as jnp
from jax import lax
from jax.experimental import pallas as pl
from jax.experimental.pallas import tpu as pltpu  # noqa: F401  (TPU backend assumed)

# ---------------- configuration (small, consistent with the module) ------------
B = 2          # batch
K = 8          # num_objs
V_DIM = 32     # obj_dim
B_DIM = 4      # b_dim (unused in forward)
S = 8          # seq_length
VOCAB = 50     # ntoken
E = 32         # word embedding dim
H = 32         # num_hid
NUM_ANS = 16   # classifier output dim
C_HID = 2 * H  # classifier hidden dim

LANES = 128
VOCAB_PAD = ((VOCAB + 7) // 8) * 8     # 56: pad embedding rows to a sublane multiple
DYN_ROWS = max(S * B, B * K)           # 16

# ---- weight-slab layout: every segment starts on an 8-aligned row -----------------
R_EMB = 0                      # [VOCAB_PAD, E]
R_WX = R_EMB + VOCAB_PAD       # [E, 3H]   input-gate weights  (r|z|n along lanes)
R_WH = R_WX + E                # [H, 3H]   hidden-gate weights (r|z|n along lanes)
R_WVP = R_WH + H               # [V_DIM, H]
R_WQP = R_WVP + V_DIM          # [H, H]
R_WQ = R_WQP + H               # [H, H]
R_WV = R_WQ + H                # [V_DIM, H]
R_WC1 = R_WV + V_DIM           # [H, C_HID]
R_WC2 = R_WC1 + H              # [C_HID, NUM_ANS]
R_BIAS = R_WC2 + C_HID         # 16 bias rows
N_ROWS = R_BIAS + 16           # 360 total rows

# bias rows inside the bias segment
BR_GXB, BR_BHN, BR_BVP, BR_BQP, BR_WATT, BR_BQ, BR_BV, BR_BC1, BR_BC2 = range(9)


# ------------------------------- fused kernel ----------------------------------
def fused_kernel(w_ref, dyn_ref, out_ref):
    f32 = jnp.float32

    def wrow(r, cols):  # single bias row as a [1, cols] tile (broadcasts over batch)
        return w_ref[R_BIAS + r:R_BIAS + r + 1, 0:cols]

    dyn = dyn_ref[...]                                    # [DYN_ROWS, V_DIM+1]
    v2 = dyn[0:B * K, 0:V_DIM]                            # [B*K, V]
    tok = dyn[0:S * B, V_DIM:V_DIM + 1].astype(jnp.int32)  # [S*B, 1] token ids

    # --- embedding lookup as a one-hot MXU matmul ----------------------------------
    # NOTE: like the previous version, a token id outside [0, VOCAB) yields a zero
    # embedding instead of an OOB gather.
    ids = lax.broadcasted_iota(jnp.int32, (S * B, VOCAB_PAD), 1)
    onehot = (ids == tok).astype(f32)                                  # [S*B, VOCAB_PAD]
    emb = w_ref[R_EMB:R_EMB + VOCAB_PAD, 0:E]                          # [VOCAB_PAD, E]
    we = jnp.dot(onehot, emb, preferred_element_type=f32)              # [S*B, E]

    # --- GRU (torch gate order r, z, n) ---------------------------------------------
    # Input projection hoisted out of the recurrence; bias_ih+bias_hh for r,z and
    # bias_ih for n folded into the hoisted term.  bh_n stays inside r*(.)
    wx_cat = w_ref[R_WX:R_WX + E, 0:3 * H]                             # [E, 3H]
    wh_cat = w_ref[R_WH:R_WH + H, 0:3 * H]                             # [H, 3H]
    gx = jnp.dot(we, wx_cat, preferred_element_type=f32) + wrow(BR_GXB, 3 * H)
    bh_n = wrow(BR_BHN, H)                                             # [1, H]

    h = jnp.zeros((B, H), f32)
    for s in range(S):                         # fully unrolled (S static & small)
        lo = s * B
        xs = gx[lo:lo + B, :]                                          # [B, 3H]
        gh = jnp.dot(h, wh_cat, preferred_element_type=f32)            # [B, 3H] one MXU push
        r = jax.nn.sigmoid(xs[:, 0:H] + gh[:, 0:H])
        z = jax.nn.sigmoid(xs[:, H:2 * H] + gh[:, H:2 * H])
        n = jnp.tanh(xs[:, 2 * H:3 * H] + r * (gh[:, 2 * H:3 * H] + bh_n))
        h = (1.0 - z) * n + z * h
    q_emb = h                                                          # [B, H]

    # --- attention over objects -------------------------------------------------------
    wvp = w_ref[R_WVP:R_WVP + V_DIM, 0:H]
    wqp = w_ref[R_WQP:R_WQP + H, 0:H]
    v_proj = jnp.maximum(
        jnp.dot(v2, wvp, preferred_element_type=f32) + wrow(BR_BVP, H), 0.0)   # [B*K, H]
    q_proj = jnp.maximum(
        jnp.dot(q_emb, wqp, preferred_element_type=f32) + wrow(BR_BQP, H), 0.0)  # [B, H]
    qw = q_proj * wrow(BR_WATT, H)                                     # watt folded in
    vp3 = v_proj.reshape(B, K, H)
    att_logits = jnp.sum(vp3 * qw[:, None, :], axis=-1)                # [B, K]  (idle XLU)
    m = jnp.max(att_logits, axis=-1, keepdims=True)
    e = jnp.exp(att_logits - m)
    denom = jnp.sum(e, axis=-1, keepdims=True)
    att = e * pl.reciprocal(denom, approx=True)                        # EUP reciprocal

    # --- attended sum as ONE 2-D MXU matmul: block-masked [B, B*K] @ [B*K, V] --------
    col = lax.broadcasted_iota(jnp.int32, (B, B * K), 1)
    row = lax.broadcasted_iota(jnp.int32, (B, B * K), 0)
    in_block = (col >= row * K) & (col < (row + 1) * K)
    att_rep = jnp.concatenate([att] * B, axis=1)                       # [B, B*K]
    att_blk = jnp.where(in_block, att_rep, 0.0)
    v_emb = jnp.dot(att_blk, v2, preferred_element_type=f32)           # [B, V_DIM]

    # --- q_net / v_net, joint, classifier --------------------------------------------
    wq = w_ref[R_WQ:R_WQ + H, 0:H]
    wv = w_ref[R_WV:R_WV + V_DIM, 0:H]
    wc1 = w_ref[R_WC1:R_WC1 + H, 0:C_HID]
    wc2 = w_ref[R_WC2:R_WC2 + C_HID, 0:NUM_ANS]
    q_repr = jnp.maximum(
        jnp.dot(q_emb, wq, preferred_element_type=f32) + wrow(BR_BQ, H), 0.0)
    v_repr = jnp.maximum(
        jnp.dot(v_emb, wv, preferred_element_type=f32) + wrow(BR_BV, H), 0.0)
    joint = q_repr * v_repr
    hid = jnp.maximum(
        jnp.dot(joint, wc1, preferred_element_type=f32) + wrow(BR_BC1, C_HID), 0.0)
    out_ref[...] = (jnp.dot(hid, wc2, preferred_element_type=f32)
                    + wrow(BR_BC2, NUM_ANS))


# ------------------------------- wrappers ---------------------------------------
def pack_params(p):
    """Pack all weights/biases into one [N_ROWS, 128] f32 slab (built once, outside jit)."""
    slab = jnp.zeros((N_ROWS, LANES), jnp.float32)

    def put(s, r0, mat):
        mat = jnp.asarray(mat, jnp.float32)
        rr, cc = mat.shape
        return s.at[r0:r0 + rr, 0:cc].set(mat)

    slab = put(slab, R_EMB, p["emb"])
    wx_cat = jnp.concatenate([p["wx3"][0], p["wx3"][1], p["wx3"][2]], axis=1)  # [E, 3H]
    wh_cat = jnp.concatenate([p["wh3"][0], p["wh3"][1], p["wh3"][2]], axis=1)  # [H, 3H]
    slab = put(slab, R_WX, wx_cat)
    slab = put(slab, R_WH, wh_cat)
    slab = put(slab, R_WVP, p["wvp"])
    slab = put(slab, R_WQP, p["wqp"])
    slab = put(slab, R_WQ, p["wq"])
    slab = put(slab, R_WV, p["wv"])
    slab = put(slab, R_WC1, p["wc1"])
    slab = put(slab, R_WC2, p["wc2"])
    gxb = jnp.concatenate([p["bx3"][0] + p["bh3"][0],
                           p["bx3"][1] + p["bh3"][1],
                           p["bx3"][2]], axis=1)                               # [1, 3H]
    slab = put(slab, R_BIAS + BR_GXB, gxb)
    slab = put(slab, R_BIAS + BR_BHN, p["bh3"][2])
    slab = put(slab, R_BIAS + BR_BVP, p["bvp"])
    slab = put(slab, R_BIAS + BR_BQP, p["bqp"])
    slab = put(slab, R_BIAS + BR_WATT, p["watt"])
    slab = put(slab, R_BIAS + BR_BQ, p["bq"])
    slab = put(slab, R_BIAS + BR_BV, p["bv"])
    slab = put(slab, R_BIAS + BR_BC1, p["bc1"])
    slab = put(slab, R_BIAS + BR_BC2, p["bc2"])
    return slab


def run_fused(wslab, dyn):
    # Grid-less call: whole arrays are single VMEM blocks, two prolog DMAs total.
    return pl.pallas_call(
        fused_kernel,
        out_shape=jax.ShapeDtypeStruct((B, NUM_ANS), jnp.float32),
    )(wslab, dyn)


@jax.jit
def base_model_forward(v, b, q_tokens, labels, wslab):
    del b, labels  # unused by the forward pass (matches the PyTorch module)
    v2 = v.reshape(B * K, V_DIM).astype(jnp.float32)
    qtok = q_tokens.T.reshape(S * B).astype(jnp.float32)   # seq-major token column
    dyn = jnp.zeros((DYN_ROWS, V_DIM + 1), jnp.float32)
    dyn = dyn.at[:B * K, :V_DIM].set(v2)
    dyn = dyn.at[:S * B, V_DIM].set(qtok)
    return run_fused(wslab, dyn)


# ------------------------------ reference (pure JAX) ----------------------------
def reference_forward(v, b, q_tokens, labels, p):
    del b, labels
    we = p["emb"][q_tokens]                              # [B, S, E]
    h = jnp.zeros((B, H), jnp.float32)
    for s in range(S):
        x = we[:, s, :]
        r = jax.nn.sigmoid(x @ p["wx3"][0] + p["bx3"][0] + h @ p["wh3"][0] + p["bh3"][0])
        z = jax.nn.sigmoid(x @ p["wx3"][1] + p["bx3"][1] + h @ p["wh3"][1] + p["bh3"][1])
        n = jnp.tanh(x @ p["wx3"][2] + p["bx3"][2] + r * (h @ p["wh3"][2] + p["bh3"][2]))
        h = (1.0 - z) * n + z * h
    q_emb = h
    v_proj = jax.nn.relu(v.reshape(B * K, V_DIM) @ p["wvp"] + p["bvp"]).reshape(B, K, H)
    q_proj = jax.nn.relu(q_emb @ p["wqp"] + p["bqp"])
    att_logits = jnp.sum(v_proj * q_proj[:, None, :] * p["watt"][0][None, None, :], axis=2)
    att = jax.nn.softmax(att_logits, axis=1)
    v_emb = jnp.sum(att[:, :, None] * v, axis=1)
    q_repr = jax.nn.relu(q_emb @ p["wq"] + p["bq"])
    v_repr = jax.nn.relu(v_emb @ p["wv"] + p["bv"])
    joint = q_repr * v_repr
    hid = jax.nn.relu(joint @ p["wc1"] + p["bc1"])
    return hid @ p["wc2"] + p["bc2"]


# ------------------------------------ main ---------------------------------------
if __name__ == "__main__":
    key = jax.random.PRNGKey(0)
    ks = jax.random.split(key, 24)

    def rnd(k, shape, scale=0.1):
        return (scale * jax.random.normal(k, shape)).astype(jnp.float32)

    params = {
        # w_emb
        "emb": rnd(ks[0], (VOCAB, E), 0.5),
        # q_emb (GRU, gate order r,z,n stacked along the leading axis)
        "wx3": rnd(ks[1], (3, E, H)), "wh3": rnd(ks[2], (3, H, H)),
        "bx3": rnd(ks[3], (3, 1, H)), "bh3": rnd(ks[4], (3, 1, H)),
        # v_att: v projection, q projection, attention vector
        "wvp": rnd(ks[5], (V_DIM, H)), "bvp": rnd(ks[6], (1, H)),
        "wqp": rnd(ks[7], (H, H)), "bqp": rnd(ks[8], (1, H)),
        "watt": rnd(ks[9], (1, H)),
        # q_net / v_net
        "wq": rnd(ks[10], (H, H)), "bq": rnd(ks[11], (1, H)),
        "wv": rnd(ks[12], (V_DIM, H)), "bv": rnd(ks[13], (1, H)),
        # classifier
        "wc1": rnd(ks[14], (H, C_HID)), "bc1": rnd(ks[15], (1, C_HID)),
        "wc2": rnd(ks[16], (C_HID, NUM_ANS)), "bc2": rnd(ks[17], (1, NUM_ANS)),
    }

    v = rnd(ks[18], (B, K, V_DIM), 1.0)
    b = rnd(ks[19], (B, K, B_DIM), 1.0)            # unused by forward (as in PyTorch)
    q_tokens = jax.random.randint(ks[20], (B, S), 0, VOCAB, dtype=jnp.int32)
    labels = jnp.zeros((B, NUM_ANS), jnp.float32)  # unused by forward

    wslab = pack_params(params)                    # built once, outside jit

    logits = base_model_forward(v, b, q_tokens, labels, wslab)
    logits = jax.block_until_ready(logits)

    ref = reference_forward(v, b, q_tokens, labels, params)
    assert logits.shape == (B, NUM_ANS)
    # Tolerance relaxed to 1e-3 to accommodate the EUP approximate reciprocal in the
    # softmax normalization (pl.reciprocal(..., approx=True)).
    assert jnp.allclose(logits, ref, atol=1e-3, rtol=1e-3), "mismatch vs pure-JAX reference"

    print("KERNEL_OK")
</pallas_src>

<mosaic_0001>
module attributes {stable_mosaic.version = 11 : i64} {
  func.func @fused_kernel(%arg0: memref<360x128xf32, #tpu.memory_space<vmem>>, %arg1: memref<16x33xf32, #tpu.memory_space<vmem>>, %arg2: memref<2x16xf32, #tpu.memory_space<vmem>>) attributes {dimension_semantics = [], scalar_prefetch = 0 : i64, scratch_operands = 0 : i64, tpu.core_type = #tpu.core_type<tc>} {
    %c0 = arith.constant 0 : index
    %c0_0 = arith.constant 0 : index
    %0 = vector.load %arg1[%c0, %c0_0] : memref<16x33xf32, #tpu.memory_space<vmem>>, vector<16x33xf32>
    %1 = vector.extract_strided_slice %0 {offsets = [0, 0], sizes = [16, 32], strides = [1, 1]} : vector<16x33xf32> to vector<16x32xf32>
    %2 = vector.extract_strided_slice %0 {offsets = [0, 32], sizes = [16, 1], strides = [1, 1]} : vector<16x33xf32> to vector<16x1xf32>
    %3 = arith.fptosi %2 : vector<16x1xf32> to vector<16x1xi32>
    %4 = tpu.iota {dimensions = array<i32: 1>} : vector<16x56xi32>
    %5 = vector.broadcast %3 : vector<16x1xi32> to vector<16x56xi32>
    %6 = arith.cmpi eq, %4, %5 : vector<16x56xi32>
    %7 = arith.extui %6 : vector<16x56xi1> to vector<16x56xi32>
    %8 = arith.sitofp %7 : vector<16x56xi32> to vector<16x56xf32>
    %c0_1 = arith.constant 0 : index
    %c0_2 = arith.constant 0 : index
    %9 = vector.load %arg0[%c0_1, %c0_2] : memref<360x128xf32, #tpu.memory_space<vmem>>, vector<56x32xf32>
    %cst = arith.constant dense<0.000000e+00> : vector<16x32xf32>
    %10 = tpu.matmul %8, %9, %cst {dimension_numbers = #tpu.dot_dimension_numbers<[1], [0], [0], [1], [0, 0, 1, 1], [], []>} : vector<16x56xf32>, vector<56x32xf32>, vector<16x32xf32> -> vector<16x32xf32>
    %c56 = arith.constant 56 : index
    %c0_3 = arith.constant 0 : index
    %11 = vector.load %arg0[%c56, %c0_3] : memref<360x128xf32, #tpu.memory_space<vmem>>, vector<32x96xf32>
    %c88 = arith.constant 88 : index
    %c0_4 = arith.constant 0 : index
    %12 = vector.load %arg0[%c88, %c0_4] : memref<360x128xf32, #tpu.memory_space<vmem>>, vector<32x96xf32>
    %cst_5 = arith.constant dense<0.000000e+00> : vector<16x96xf32>
    %13 = tpu.matmul %10, %11, %cst_5 {dimension_numbers = #tpu.dot_dimension_numbers<[1], [0], [0], [1], [0, 0, 1, 1], [], []>} : vector<16x32xf32>, vector<32x96xf32>, vector<16x96xf32> -> vector<16x96xf32>
    %c344 = arith.constant 344 : index
    %c0_6 = arith.constant 0 : index
    %14 = vector.load %arg0[%c344, %c0_6] : memref<360x128xf32, #tpu.memory_space<vmem>>, vector<1x96xf32>
    %15 = vector.broadcast %14 : vector<1x96xf32> to vector<16x96xf32>
    %16 = arith.addf %13, %15 : vector<16x96xf32>
    %c345 = arith.constant 345 : index
    %c0_7 = arith.constant 0 : index
    %17 = vector.load %arg0[%c345, %c0_7] : memref<360x128xf32, #tpu.memory_space<vmem>>, vector<1x32xf32>
    %cst_8 = arith.constant 0.000000e+00 : f32
    %18 = vector.broadcast %cst_8 : f32 to vector<2x32xf32>
    %19 = vector.extract_strided_slice %16 {offsets = [0, 0], sizes = [2, 96], strides = [1, 1]} : vector<16x96xf32> to vector<2x96xf32>
    %cst_9 = arith.constant dense<0.000000e+00> : vector<2x96xf32>
    %20 = tpu.matmul %18, %12, %cst_9 {dimension_numbers = #tpu.dot_dimension_numbers<[1], [0], [0], [1], [0, 0, 1, 1], [], []>} : vector<2x32xf32>, vector<32x96xf32>, vector<2x96xf32> -> vector<2x96xf32>
    %21 = vector.extract_strided_slice %19 {offsets = [0, 0], sizes = [2, 32], strides = [1, 1]} : vector<2x96xf32> to vector<2x32xf32>
    %22 = vector.extract_strided_slice %20 {offsets = [0, 0], sizes = [2, 32], strides = [1, 1]} : vector<2x96xf32> to vector<2x32xf32>
    %23 = arith.addf %21, %22 : vector<2x32xf32>
    %24 = arith.negf %23 : vector<2x32xf32>
    %25 = math.exp %24 : vector<2x32xf32>
    %cst_10 = arith.constant 1.000000e+00 : f32
    %26 = vector.broadcast %cst_10 : f32 to vector<2x32xf32>
    %27 = arith.addf %26, %25 : vector<2x32xf32>
    %28 = arith.divf %26, %27 : vector<2x32xf32>
    %29 = vector.extract_strided_slice %19 {offsets = [0, 32], sizes = [2, 32], strides = [1, 1]} : vector<2x96xf32> to vector<2x32xf32>
    %30 = vector.extract_strided_slice %20 {offsets = [0, 32], sizes = [2, 32], strides = [1, 1]} : vector<2x96xf32> to vector<2x32xf32>
    %31 = arith.addf %29, %30 : vector<2x32xf32>
    %32 = arith.negf %31 : vector<2x32xf32>
    %33 = math.exp %32 : vector<2x32xf32>
    %cst_11 = arith.constant 1.000000e+00 : f32
    %34 = vector.broadcast %cst_11 : f32 to vector<2x32xf32>
    %35 = arith.addf %34, %33 : vector<2x32xf32>
    %36 = arith.divf %34, %35 : vector<2x32xf32>
    %37 = vector.extract_strided_slice %19 {offsets = [0, 64], sizes = [2, 32], strides = [1, 1]} : vector<2x96xf32> to vector<2x32xf32>
    %38 = vector.extract_strided_slice %20 {offsets = [0, 64], sizes = [2, 32], strides = [1, 1]} : vector<2x96xf32> to vector<2x32xf32>
    %39 = vector.broadcast %17 : vector<1x32xf32> to vector<2x32xf32>
    %40 = arith.addf %38, %39 : vector<2x32xf32>
    %41 = arith.mulf %28, %40 : vector<2x32xf32>
    %42 = arith.addf %37, %41 : vector<2x32xf32>
    %43 = math.tanh %42 : vector<2x32xf32>
    %cst_12 = arith.constant 1.000000e+00 : f32
    %44 = vector.broadcast %cst_12 : f32 to vector<2x32xf32>
    %45 = arith.subf %44, %36 : vector<2x32xf32>
    %46 = arith.mulf %45, %43 : vector<2x32xf32>
    %47 = arith.mulf %36, %18 : vector<2x32xf32>
    %48 = arith.addf %46, %47 : vector<2x32xf32>
    %49 = vector.extract_strided_slice %16 {offsets = [2, 0], sizes = [2, 96], strides = [1, 1]} : vector<16x96xf32> to vector<2x96xf32>
    %cst_13 = arith.constant dense<0.000000e+00> : vector<2x96xf32>
    %50 = tpu.matmul %48, %12, %cst_13 {dimension_numbers = #tpu.dot_dimension_numbers<[1], [0], [0], [1], [0, 0, 1, 1], [], []>} : vector<2x32xf32>, vector<32x96xf32>, vector<2x96xf32> -> vector<2x96xf32>
    %51 = vector.extract_strided_slice %49 {offsets = [0, 0], sizes = [2, 32], strides = [1, 1]} : vector<2x96xf32> to vector<2x32xf32>
    %52 = vector.extract_strided_slice %50 {offsets = [0, 0], sizes = [2, 32], strides = [1, 1]} : vector<2x96xf32> to vector<2x32xf32>
    %53 = arith.addf %51, %52 : vector<2x32xf32>
    %54 = arith.negf %53 : vector<2x32xf32>
    %55 = math.exp %54 : vector<2x32xf32>
    %cst_14 = arith.constant 1.000000e+00 : f32
    %56 = vector.broadcast %cst_14 : f32 to vector<2x32xf32>
    %57 = arith.addf %56, %55 : vector<2x32xf32>
    %58 = arith.divf %56, %57 : vector<2x32xf32>
    %59 = vector.extract_strided_slice %49 {offsets = [0, 32], sizes = [2, 32], strides = [1, 1]} : vector<2x96xf32> to vector<2x32xf32>
    %60 = vector.extract_strided_slice %50 {offsets = [0, 32], sizes = [2, 32], strides = [1, 1]} : vector<2x96xf32> to vector<2x32xf32>
    %61 = arith.addf %59, %60 : vector<2x32xf32>
    %62 = arith.negf %61 : vector<2x32xf32>
    %63 = math.exp %62 : vector<2x32xf32>
    %cst_15 = arith.constant 1.000000e+00 : f32
    %64 = vector.broadcast %cst_15 : f32 to vector<2x32xf32>
    %65 = arith.addf %64, %63 : vector<2x32xf32>
    %66 = arith.divf %64, %65 : vector<2x32xf32>
    %67 = vector.extract_strided_slice %49 {offsets = [0, 64], sizes = [2, 32], strides = [1, 1]} : vector<2x96xf32> to vector<2x32xf32>
    %68 = vector.extract_strided_slice %50 {offsets = [0, 64], sizes = [2, 32], strides = [1, 1]} : vector<2x96xf32> to vector<2x32xf32>
    %69 = vector.broadcast %17 : vector<1x32xf32> to vector<2x32xf32>
    %70 = arith.addf %68, %69 : vector<2x32xf32>
    %71 = arith.mulf %58, %70 : vector<2x32xf32>
    %72 = arith.addf %67, %71 : vector<2x32xf32>
    %73 = math.tanh %72 : vector<2x32xf32>
    %cst_16 = arith.constant 1.000000e+00 : f32
    %74 = vector.broadcast %cst_16 : f32 to vector<2x32xf32>
    %75 = arith.subf %74, %66 : vector<2x32xf32>
    %76 = arith.mulf %75, %73 : vector<2x32xf32>
    %77 = arith.mulf %66, %48 : vector<2x32xf32>
    %78 = arith.addf %76, %77 : vector<2x32xf32>
    %79 = vector.extract_strided_slice %16 {offsets = [4, 0], sizes = [2, 96], strides = [1, 1]} : vector<16x96xf32> to vector<2x96xf32>
    %cst_17 = arith.constant dense<0.000000e+00> : vector<2x96xf32>
    %80 = tpu.matmul %78, %12, %cst_17 {dimension_numbers = #tpu.dot_dimension_numbers<[1], [0], [0], [1], [0, 0, 1, 1], [], []>} : vector<2x32xf32>, vector<32x96xf32>, vector<2x96xf32> -> vector<2x96xf32>
    %81 = vector.extract_strided_slice %79 {offsets = [0, 0], sizes = [2, 32], strides = [1, 1]} : vector<2x96xf32> to vector<2x32xf32>
    %82 = vector.extract_strided_slice %80 {offsets = [0, 0], sizes = [2, 32], strides = [1, 1]} : vector<2x96xf32> to vector<2x32xf32>
    %83 = arith.addf %81, %82 : vector<2x32xf32>
    %84 = arith.negf %83 : vector<2x32xf32>
    %85 = math.exp %84 : vector<2x32xf32>
    %cst_18 = arith.constant 1.000000e+00 : f32
    %86 = vector.broadcast %cst_18 : f32 to vector<2x32xf32>
    %87 = arith.addf %86, %85 : vector<2x32xf32>
    %88 = arith.divf %86, %87 : vector<2x32xf32>
    %89 = vector.extract_strided_slice %79 {offsets = [0, 32], sizes = [2, 32], strides = [1, 1]} : vector<2x96xf32> to vector<2x32xf32>
    %90 = vector.extract_strided_slice %80 {offsets = [0, 32], sizes = [2, 32], strides = [1, 1]} : vector<2x96xf32> to vector<2x32xf32>
    %91 = arith.addf %89, %90 : vector<2x32xf32>
    %92 = arith.negf %91 : vector<2x32xf32>
    %93 = math.exp %92 : vector<2x32xf32>
    %cst_19 = arith.constant 1.000000e+00 : f32
    %94 = vector.broadcast %cst_19 : f32 to vector<2x32xf32>
    %95 = arith.addf %94, %93 : vector<2x32xf32>
    %96 = arith.divf %94, %95 : vector<2x32xf32>
    %97 = vector.extract_strided_slice %79 {offsets = [0, 64], sizes = [2, 32], strides = [1, 1]} : vector<2x96xf32> to vector<2x32xf32>
    %98 = vector.extract_strided_slice %80 {offsets = [0, 64], sizes = [2, 32], strides = [1, 1]} : vector<2x96xf32> to vector<2x32xf32>
    %99 = vector.broadcast %17 : vector<1x32xf32> to vector<2x32xf32>
    %100 = arith.addf %98, %99 : vector<2x32xf32>
    %101 = arith.mulf %88, %100 : vector<2x32xf32>
    %102 = arith.addf %97, %101 : vector<2x32xf32>
    %103 = math.tanh %102 : vector<2x32xf32>
    %cst_20 = arith.constant 1.000000e+00 : f32
    %104 = vector.broadcast %cst_20 : f32 to vector<2x32xf32>
    %105 = arith.subf %104, %96 : vector<2x32xf32>
    %106 = arith.mulf %105, %103 : vector<2x32xf32>
    %107 = arith.mulf %96, %78 : vector<2x32xf32>
    %108 = arith.addf %106, %107 : vector<2x32xf32>
    %109 = vector.extract_strided_slice %16 {offsets = [6, 0], sizes = [2, 96], strides = [1, 1]} : vector<16x96xf32> to vector<2x96xf32>
    %cst_21 = arith.constant dense<0.000000e+00> : vector<2x96xf32>
    %110 = tpu.matmul %108, %12, %cst_21 {dimension_numbers = #tpu.dot_dimension_numbers<[1], [0], [0], [1], [0, 0, 1, 1], [], []>} : vector<2x32xf32>, vector<32x96xf32>, vector<2x96xf32> -> vector<2x96xf32>
    %111 = vector.extract_strided_slice %109 {offsets = [0, 0], sizes = [2, 32], strides = [1, 1]} : vector<2x96xf32> to vector<2x32xf32>
    %112 = vector.extract_strided_slice %110 {offsets = [0, 0], sizes = [2, 32], strides = [1, 1]} : vector<2x96xf32> to vector<2x32xf32>
    %113 = arith.addf %111, %112 : vector<2x32xf32>
    %114 = arith.negf %113 : vector<2x32xf32>
    %115 = math.exp %114 : vector<2x32xf32>
    %cst_22 = arith.constant 1.000000e+00 : f32
    %116 = vector.broadcast %cst_22 : f32 to vector<2x32xf32>
    %117 = arith.addf %116, %115 : vector<2x32xf32>
    %118 = arith.divf %116, %117 : vector<2x32xf32>
    %119 = vector.extract_strided_slice %109 {offsets = [0, 32], sizes = [2, 32], strides = [1, 1]} : vector<2x96xf32> to vector<2x32xf32>
    %120 = vector.extract_strided_slice %110 {offsets = [0, 32], sizes = [2, 32], strides = [1, 1]} : vector<2x96xf32> to vector<2x32xf32>
    %121 = arith.addf %119, %120 : vector<2x32xf32>
    %122 = arith.negf %121 : vector<2x32xf32>
    %123 = math.exp %122 : vector<2x32xf32>
    %cst_23 = arith.constant 1.000000e+00 : f32
    %124 = vector.broadcast %cst_23 : f32 to vector<2x32xf32>
    %125 = arith.addf %124, %123 : vector<2x32xf32>
    %126 = arith.divf %124, %125 : vector<2x32xf32>
    %127 = vector.extract_strided_slice %109 {offsets = [0, 64], sizes = [2, 32], strides = [1, 1]} : vector<2x96xf32> to vector<2x32xf32>
    %128 = vector.extract_strided_slice %110 {offsets = [0, 64], sizes = [2, 32], strides = [1, 1]} : vector<2x96xf32> to vector<2x32xf32>
    %129 = vector.broadcast %17 : vector<1x32xf32> to vector<2x32xf32>
    %130 = arith.addf %128, %129 : vector<2x32xf32>
    %131 = arith.mulf %118, %130 : vector<2x32xf32>
    %132 = arith.addf %127, %131 : vector<2x32xf32>
    %133 = math.tanh %132 : vector<2x32xf32>
    %cst_24 = arith.constant 1.000000e+00 : f32
    %134 = vector.broadcast %cst_24 : f32 to vector<2x32xf32>
    %135 = arith.subf %134, %126 : vector<2x32xf32>
    %136 = arith.mulf %135, %133 : vector<2x32xf32>
    %137 = arith.mulf %126, %108 : vector<2x32xf32>
    %138 = arith.addf %136, %137 : vector<2x32xf32>
    %139 = vector.extract_strided_slice %16 {offsets = [8, 0], sizes = [2, 96], strides = [1, 1]} : vector<16x96xf32> to vector<2x96xf32>
    %cst_25 = arith.constant dense<0.000000e+00> : vector<2x96xf32>
    %140 = tpu.matmul %138, %12, %cst_25 {dimension_numbers = #tpu.dot_dimension_numbers<[1], [0], [0], [1], [0, 0, 1, 1], [], []>} : vector<2x32xf32>, vector<32x96xf32>, vector<2x96xf32> -> vector<2x96xf32>
    %141 = vector.extract_strided_slice %139 {offsets = [0, 0], sizes = [2, 32], strides = [1, 1]} : vector<2x96xf32> to vector<2x32xf32>
    %142 = vector.extract_strided_slice %140 {offsets = [0, 0], sizes = [2, 32], strides = [1, 1]} : vector<2x96xf32> to vector<2x32xf32>
    %143 = arith.addf %141, %142 : vector<2x32xf32>
    %144 = arith.negf %143 : vector<2x32xf32>
    %145 = math.exp %144 : vector<2x32xf32>
    %cst_26 = arith.constant 1.000000e+00 : f32
    %146 = vector.broadcast %cst_26 : f32 to vector<2x32xf32>
    %147 = arith.addf %146, %145 : vector<2x32xf32>
    %148 = arith.divf %146, %147 : vector<2x32xf32>
    %149 = vector.extract_strided_slice %139 {offsets = [0, 32], sizes = [2, 32], strides = [1, 1]} : vector<2x96xf32> to vector<2x32xf32>
    %150 = vector.extract_strided_slice %140 {offsets = [0, 32], sizes = [2, 32], strides = [1, 1]} : vector<2x96xf32> to vector<2x32xf32>
    %151 = arith.addf %149, %150 : vector<2x32xf32>
    %152 = arith.negf %151 : vector<2x32xf32>
    %153 = math.exp %152 : vector<2x32xf32>
    %cst_27 = arith.constant 1.000000e+00 : f32
    %154 = vector.broadcast %cst_27 : f32 to vector<2x32xf32>
    %155 = arith.addf %154, %153 : vector<2x32xf32>
    %156 = arith.divf %154, %155 : vector<2x32xf32>
    %157 = vector.extract_strided_slice %139 {offsets = [0, 64], sizes = [2, 32], strides = [1, 1]} : vector<2x96xf32> to vector<2x32xf32>
    %158 = vector.extract_strided_slice %140 {offsets = [0, 64], sizes = [2, 32], strides = [1, 1]} : vector<2x96xf32> to vector<2x32xf32>
    %159 = vector.broadcast %17 : vector<1x32xf32> to vector<2x32xf32>
    %160 = arith.addf %158, %159 : vector<2x32xf32>
    %161 = arith.mulf %148, %160 : vector<2x32xf32>
    %162 = arith.addf %157, %161 : vector<2x32xf32>
    %163 = math.tanh %162 : vector<2x32xf32>
    %cst_28 = arith.constant 1.000000e+00 : f32
    %164 = vector.broadcast %cst_28 : f32 to vector<2x32xf32>
    %165 = arith.subf %164, %156 : vector<2x32xf32>
    %166 = arith.mulf %165, %163 : vector<2x32xf32>
    %167 = arith.mulf %156, %138 : vector<2x32xf32>
    %168 = arith.addf %166, %167 : vector<2x32xf32>
    %169 = vector.extract_strided_slice %16 {offsets = [10, 0], sizes = [2, 96], strides = [1, 1]} : vector<16x96xf32> to vector<2x96xf32>
    %cst_29 = arith.constant dense<0.000000e+00> : vector<2x96xf32>
    %170 = tpu.matmul %168, %12, %cst_29 {dimension_numbers = #tpu.dot_dimension_numbers<[1], [0], [0], [1], [0, 0, 1, 1], [], []>} : vector<2x32xf32>, vector<32x96xf32>, vector<2x96xf32> -> vector<2x96xf32>
    %171 = vector.extract_strided_slice %169 {offsets = [0, 0], sizes = [2, 32], strides = [1, 1]} : vector<2x96xf32> to vector<2x32xf32>
    %172 = vector.extract_strided_slice %170 {offsets = [0, 0], sizes = [2, 32], strides = [1, 1]} : vector<2x96xf32> to vector<2x32xf32>
    %173 = arith.addf %171, %172 : vector<2x32xf32>
    %174 = arith.negf %173 : vector<2x32xf32>
    %175 = math.exp %174 : vector<2x32xf32>
    %cst_30 = arith.constant 1.000000e+00 : f32
    %176 = vector.broadcast %cst_30 : f32 to vector<2x32xf32>
    %177 = arith.addf %176, %175 : vector<2x32xf32>
    %178 = arith.divf %176, %177 : vector<2x32xf32>
    %179 = vector.extract_strided_slice %169 {offsets = [0, 32], sizes = [2, 32], strides = [1, 1]} : vector<2x96xf32> to vector<2x32xf32>
    %180 = vector.extract_strided_slice %170 {offsets = [0, 32], sizes = [2, 32], strides = [1, 1]} : vector<2x96xf32> to vector<2x32xf32>
    %181 = arith.addf %179, %180 : vector<2x32xf32>
    %182 = arith.negf %181 : vector<2x32xf32>
    %183 = math.exp %182 : vector<2x32xf32>
    %cst_31 = arith.constant 1.000000e+00 : f32
    %184 = vector.broadcast %cst_31 : f32 to vector<2x32xf32>
    %185 = arith.addf %184, %183 : vector<2x32xf32>
    %186 = arith.divf %184, %185 : vector<2x32xf32>
    %187 = vector.extract_strided_slice %169 {offsets = [0, 64], sizes = [2, 32], strides = [1, 1]} : vector<2x96xf32> to vector<2x32xf32>
    %188 = vector.extract_strided_slice %170 {offsets = [0, 64], sizes = [2, 32], strides = [1, 1]} : vector<2x96xf32> to vector<2x32xf32>
    %189 = vector.broadcast %17 : vector<1x32xf32> to vector<2x32xf32>
    %190 = arith.addf %188, %189 : vector<2x32xf32>
    %191 = arith.mulf %178, %190 : vector<2x32xf32>
    %192 = arith.addf %187, %191 : vector<2x32xf32>
    %193 = math.tanh %192 : vector<2x32xf32>
    %cst_32 = arith.constant 1.000000e+00 : f32
    %194 = vector.broadcast %cst_32 : f32 to vector<2x32xf32>
    %195 = arith.subf %194, %186 : vector<2x32xf32>
    %196 = arith.mulf %195, %193 : vector<2x32xf32>
    %197 = arith.mulf %186, %168 : vector<2x32xf32>
    %198 = arith.addf %196, %197 : vector<2x32xf32>
    %199 = vector.extract_strided_slice %16 {offsets = [12, 0], sizes = [2, 96], strides = [1, 1]} : vector<16x96xf32> to vector<2x96xf32>
    %cst_33 = arith.constant dense<0.000000e+00> : vector<2x96xf32>
    %200 = tpu.matmul %198, %12, %cst_33 {dimension_numbers = #tpu.dot_dimension_numbers<[1], [0], [0], [1], [0, 0, 1, 1], [], []>} : vector<2x32xf32>, vector<32x96xf32>, vector<2x96xf32> -> vector<2x96xf32>
    %201 = vector.extract_strided_slice %199 {offsets = [0, 0], sizes = [2, 32], strides = [1, 1]} : vector<2x96xf32> to vector<2x32xf32>
    %202 = vector.extract_strided_slice %200 {offsets = [0, 0], sizes = [2, 32], strides = [1, 1]} : vector<2x96xf32> to vector<2x32xf32>
    %203 = arith.addf %201, %202 : vector<2x32xf32>
    %204 = arith.negf %203 : vector<2x32xf32>
    %205 = math.exp %204 : vector<2x32xf32>
    %cst_34 = arith.constant 1.000000e+00 : f32
    %206 = vector.broadcast %cst_34 : f32 to vector<2x32xf32>
    %207 = arith.addf %206, %205 : vector<2x32xf32>
    %208 = arith.divf %206, %207 : vector<2x32xf32>
    %209 = vector.extract_strided_slice %199 {offsets = [0, 32], sizes = [2, 32], strides = [1, 1]} : vector<2x96xf32> to vector<2x32xf32>
    %210 = vector.extract_strided_slice %200 {offsets = [0, 32], sizes = [2, 32], strides = [1, 1]} : vector<2x96xf32> to vector<2x32xf32>
    %211 = arith.addf %209, %210 : vector<2x32xf32>
    %212 = arith.negf %211 : vector<2x32xf32>
    %213 = math.exp %212 : vector<2x32xf32>
    %cst_35 = arith.constant 1.000000e+00 : f32
    %214 = vector.broadcast %cst_35 : f32 to vector<2x32xf32>
    %215 = arith.addf %214, %213 : vector<2x32xf32>
    %216 = arith.divf %214, %215 : vector<2x32xf32>
    %217 = vector.extract_strided_slice %199 {offsets = [0, 64], sizes = [2, 32], strides = [1, 1]} : vector<2x96xf32> to vector<2x32xf32>
    %218 = vector.extract_strided_slice %200 {offsets = [0, 64], sizes = [2, 32], strides = [1, 1]} : vector<2x96xf32> to vector<2x32xf32>
    %219 = vector.broadcast %17 : vector<1x32xf32> to vector<2x32xf32>
    %220 = arith.addf %218, %219 : vector<2x32xf32>
    %221 = arith.mulf %208, %220 : vector<2x32xf32>
    %222 = arith.addf %217, %221 : vector<2x32xf32>
    %223 = math.tanh %222 : vector<2x32xf32>
    %cst_36 = arith.constant 1.000000e+00 : f32
    %224 = vector.broadcast %cst_36 : f32 to vector<2x32xf32>
    %225 = arith.subf %224, %216 : vector<2x32xf32>
    %226 = arith.mulf %225, %223 : vector<2x32xf32>
    %227 = arith.mulf %216, %198 : vector<2x32xf32>
    %228 = arith.addf %226, %227 : vector<2x32xf32>
    %229 = vector.extract_strided_slice %16 {offsets = [14, 0], sizes = [2, 96], strides = [1, 1]} : vector<16x96xf32> to vector<2x96xf32>
    %cst_37 = arith.constant dense<0.000000e+00> : vector<2x96xf32>
    %230 = tpu.matmul %228, %12, %cst_37 {dimension_numbers = #tpu.dot_dimension_numbers<[1], [0], [0], [1], [0, 0, 1, 1], [], []>} : vector<2x32xf32>, vector<32x96xf32>, vector<2x96xf32> -> vector<2x96xf32>
    %231 = vector.extract_strided_slice %229 {offsets = [0, 0], sizes = [2, 32], strides = [1, 1]} : vector<2x96xf32> to vector<2x32xf32>
    %232 = vector.extract_strided_slice %230 {offsets = [0, 0], sizes = [2, 32], strides = [1, 1]} : vector<2x96xf32> to vector<2x32xf32>
    %233 = arith.addf %231, %232 : vector<2x32xf32>
    %234 = arith.negf %233 : vector<2x32xf32>
    %235 = math.exp %234 : vector<2x32xf32>
    %cst_38 = arith.constant 1.000000e+00 : f32
    %236 = vector.broadcast %cst_38 : f32 to vector<2x32xf32>
    %237 = arith.addf %236, %235 : vector<2x32xf32>
    %238 = arith.divf %236, %237 : vector<2x32xf32>
    %239 = vector.extract_strided_slice %229 {offsets = [0, 32], sizes = [2, 32], strides = [1, 1]} : vector<2x96xf32> to vector<2x32xf32>
    %240 = vector.extract_strided_slice %230 {offsets = [0, 32], sizes = [2, 32], strides = [1, 1]} : vector<2x96xf32> to vector<2x32xf32>
    %241 = arith.addf %239, %240 : vector<2x32xf32>
    %242 = arith.negf %241 : vector<2x32xf32>
    %243 = math.exp %242 : vector<2x32xf32>
    %cst_39 = arith.constant 1.000000e+00 : f32
    %244 = vector.broadcast %cst_39 : f32 to vector<2x32xf32>
    %245 = arith.addf %244, %243 : vector<2x32xf32>
    %246 = arith.divf %244, %245 : vector<2x32xf32>
    %247 = vector.extract_strided_slice %229 {offsets = [0, 64], sizes = [2, 32], strides = [1, 1]} : vector<2x96xf32> to vector<2x32xf32>
    %248 = vector.extract_strided_slice %230 {offsets = [0, 64], sizes = [2, 32], strides = [1, 1]} : vector<2x96xf32> to vector<2x32xf32>
    %249 = vector.broadcast %17 : vector<1x32xf32> to vector<2x32xf32>
    %250 = arith.addf %248, %249 : vector<2x32xf32>
    %251 = arith.mulf %238, %250 : vector<2x32xf32>
    %252 = arith.addf %247, %251 : vector<2x32xf32>
    %253 = math.tanh %252 : vector<2x32xf32>
    %cst_40 = arith.constant 1.000000e+00 : f32
    %254 = vector.broadcast %cst_40 : f32 to vector<2x32xf32>
    %255 = arith.subf %254, %246 : vector<2x32xf32>
    %256 = arith.mulf %255, %253 : vector<2x32xf32>
    %257 = arith.mulf %246, %228 : vector<2x32xf32>
    %258 = arith.addf %256, %257 : vector<2x32xf32>
    %c120 = arith.constant 120 : index
    %c0_41 = arith.constant 0 : index
    %259 = vector.load %arg0[%c120, %c0_41] : memref<360x128xf32, #tpu.memory_space<vmem>>, vector<32x32xf32>
    %c152 = arith.constant 152 : index
    %c0_42 = arith.constant 0 : index
    %260 = vector.load %arg0[%c152, %c0_42] : memref<360x128xf32, #tpu.memory_space<vmem>>, vector<32x32xf32>
    %cst_43 = arith.constant dense<0.000000e+00> : vector<16x32xf32>
    %261 = tpu.matmul %1, %259, %cst_43 {dimension_numbers = #tpu.dot_dimension_numbers<[1], [0], [0], [1], [0, 0, 1, 1], [], []>} : vector<16x32xf32>, vector<32x32xf32>, vector<16x32xf32> -> vector<16x32xf32>
    %c346 = arith.constant 346 : index
    %c0_44 = arith.constant 0 : index
    %262 = vector.load %arg0[%c346, %c0_44] : memref<360x128xf32, #tpu.memory_space<vmem>>, vector<1x32xf32>
    %263 = vector.broadcast %262 : vector<1x32xf32> to vector<16x32xf32>
    %264 = arith.addf %261, %263 : vector<16x32xf32>
    %cst_45 = arith.constant 0.000000e+00 : f32
    %265 = vector.broadcast %cst_45 : f32 to vector<16x32xf32>
    %266 = arith.maximumf %264, %265 : vector<16x32xf32>
    %cst_46 = arith.constant dense<0.000000e+00> : vector<2x32xf32>
    %267 = tpu.matmul %258, %260, %cst_46 {dimension_numbers = #tpu.dot_dimension_numbers<[1], [0], [0], [1], [0, 0, 1, 1], [], []>} : vector<2x32xf32>, vector<32x32xf32>, vector<2x32xf32> -> vector<2x32xf32>
    %c347 = arith.constant 347 : index
    %c0_47 = arith.constant 0 : index
    %268 = vector.load %arg0[%c347, %c0_47] : memref<360x128xf32, #tpu.memory_space<vmem>>, vector<1x32xf32>
    %269 = vector.broadcast %268 : vector<1x32xf32> to vector<2x32xf32>
    %270 = arith.addf %267, %269 : vector<2x32xf32>
    %cst_48 = arith.constant 0.000000e+00 : f32
    %271 = vector.broadcast %cst_48 : f32 to vector<2x32xf32>
    %272 = arith.maximumf %270, %271 : vector<2x32xf32>
    %c348 = arith.constant 348 : index
    %c0_49 = arith.constant 0 : index
    %273 = vector.load %arg0[%c348, %c0_49] : memref<360x128xf32, #tpu.memory_space<vmem>>, vector<1x32xf32>
    %274 = vector.broadcast %273 : vector<1x32xf32> to vector<2x32xf32>
    %275 = arith.mulf %272, %274 : vector<2x32xf32>
    %276 = vector.shape_cast %266 : vector<16x32xf32> to vector<2x8x32xf32>
    %277 = vector.shape_cast %275 : vector<2x32xf32> to vector<2x1x32xf32>
    %278 = vector.broadcast %277 : vector<2x1x32xf32> to vector<2x8x32xf32>
    %279 = arith.mulf %276, %278 : vector<2x8x32xf32>
    %cst_50 = arith.constant dense<0.000000e+00> : vector<2x8xf32>
    %280 = vector.multi_reduction <add>, %279, %cst_50 [2] : vector<2x8x32xf32> to vector<2x8xf32>
    %cst_51 = arith.constant dense<0xFF800000> : vector<2xf32>
    %281 = vector.multi_reduction <maximumf>, %280, %cst_51 [1] : vector<2x8xf32> to vector<2xf32>
    %282 = vector.shape_cast %281 : vector<2xf32> to vector<2x1xf32>
    %283 = vector.broadcast %282 : vector<2x1xf32> to vector<2x8xf32>
    %284 = arith.subf %280, %283 : vector<2x8xf32>
    %285 = math.exp %284 : vector<2x8xf32>
    %cst_52 = arith.constant dense<0.000000e+00> : vector<2xf32>
    %286 = vector.multi_reduction <add>, %285, %cst_52 [1] : vector<2x8xf32> to vector<2xf32>
    %287 = vector.shape_cast %286 : vector<2xf32> to vector<2x1xf32>
    %288 = tpu.reciprocal %287 {approx = true} : vector<2x1xf32> -> vector<2x1xf32>
    %289 = vector.broadcast %288 : vector<2x1xf32> to vector<2x8xf32>
    %290 = arith.mulf %285, %289 : vector<2x8xf32>
    %291 = tpu.iota {dimensions = array<i32: 1>} : vector<2x16xi32>
    %292 = tpu.iota {dimensions = array<i32: 0>} : vector<2x16xi32>
    %c8_i32 = arith.constant 8 : i32
    %293 = vector.broadcast %c8_i32 : i32 to vector<2x16xi32>
    %294 = arith.muli %292, %293 : vector<2x16xi32>
    %295 = arith.cmpi sge, %291, %294 : vector<2x16xi32>
    %c1_i32 = arith.constant 1 : i32
    %296 = vector.broadcast %c1_i32 : i32 to vector<2x16xi32>
    %297 = arith.addi %292, %296 : vector<2x16xi32>
    %c8_i32_53 = arith.constant 8 : i32
    %298 = vector.broadcast %c8_i32_53 : i32 to vector<2x16xi32>
    %299 = arith.muli %297, %298 : vector<2x16xi32>
    %300 = arith.cmpi slt, %291, %299 : vector<2x16xi32>
    %301 = arith.andi %295, %300 : vector<2x16xi1>
    %302 = tpu.concatenate %290, %290 in 1 : vector<2x8xf32>, vector<2x8xf32> -> vector<2x16xf32>
    %cst_54 = arith.constant 0.000000e+00 : f32
    %303 = vector.broadcast %cst_54 : f32 to vector<2x16xf32>
    %304 = arith.select %301, %302, %303 : vector<2x16xi1>, vector<2x16xf32>
    %cst_55 = arith.constant dense<0.000000e+00> : vector<2x32xf32>
    %305 = tpu.matmul %304, %1, %cst_55 {dimension_numbers = #tpu.dot_dimension_numbers<[1], [0], [0], [1], [0, 0, 1, 1], [], []>} : vector<2x16xf32>, vector<16x32xf32>, vector<2x32xf32> -> vector<2x32xf32>
    %c184 = arith.constant 184 : index
    %c0_56 = arith.constant 0 : index
    %306 = vector.load %arg0[%c184, %c0_56] : memref<360x128xf32, #tpu.memory_space<vmem>>, vector<32x32xf32>
    %c216 = arith.constant 216 : index
    %c0_57 = arith.constant 0 : index
    %307 = vector.load %arg0[%c216, %c0_57] : memref<360x128xf32, #tpu.memory_space<vmem>>, vector<32x32xf32>
    %c248 = arith.constant 248 : index
    %c0_58 = arith.constant 0 : index
    %308 = vector.load %arg0[%c248, %c0_58] : memref<360x128xf32, #tpu.memory_space<vmem>>, vector<32x64xf32>
    %c280 = arith.constant 280 : index
    %c0_59 = arith.constant 0 : index
    %309 = vector.load %arg0[%c280, %c0_59] : memref<360x128xf32, #tpu.memory_space<vmem>>, vector<64x16xf32>
    %cst_60 = arith.constant dense<0.000000e+00> : vector<2x32xf32>
    %310 = tpu.matmul %258, %306, %cst_60 {dimension_numbers = #tpu.dot_dimension_numbers<[1], [0], [0], [1], [0, 0, 1, 1], [], []>} : vector<2x32xf32>, vector<32x32xf32>, vector<2x32xf32> -> vector<2x32xf32>
    %c349 = arith.constant 349 : index
    %c0_61 = arith.constant 0 : index
    %311 = vector.load %arg0[%c349, %c0_61] : memref<360x128xf32, #tpu.memory_space<vmem>>, vector<1x32xf32>
    %312 = vector.broadcast %311 : vector<1x32xf32> to vector<2x32xf32>
    %313 = arith.addf %310, %312 : vector<2x32xf32>
    %cst_62 = arith.constant 0.000000e+00 : f32
    %314 = vector.broadcast %cst_62 : f32 to vector<2x32xf32>
    %315 = arith.maximumf %313, %314 : vector<2x32xf32>
    %cst_63 = arith.constant dense<0.000000e+00> : vector<2x32xf32>
    %316 = tpu.matmul %305, %307, %cst_63 {dimension_numbers = #tpu.dot_dimension_numbers<[1], [0], [0], [1], [0, 0, 1, 1], [], []>} : vector<2x32xf32>, vector<32x32xf32>, vector<2x32xf32> -> vector<2x32xf32>
    %c350 = arith.constant 350 : index
    %c0_64 = arith.constant 0 : index
    %317 = vector.load %arg0[%c350, %c0_64] : memref<360x128xf32, #tpu.memory_space<vmem>>, vector<1x32xf32>
    %318 = vector.broadcast %317 : vector<1x32xf32> to vector<2x32xf32>
    %319 = arith.addf %316, %318 : vector<2x32xf32>
    %cst_65 = arith.constant 0.000000e+00 : f32
    %320 = vector.broadcast %cst_65 : f32 to vector<2x32xf32>
    %321 = arith.maximumf %319, %320 : vector<2x32xf32>
    %322 = arith.mulf %315, %321 : vector<2x32xf32>
    %cst_66 = arith.constant dense<0.000000e+00> : vector<2x64xf32>
    %323 = tpu.matmul %322, %308, %cst_66 {dimension_numbers = #tpu.dot_dimension_numbers<[1], [0], [0], [1], [0, 0, 1, 1], [], []>} : vector<2x32xf32>, vector<32x64xf32>, vector<2x64xf32> -> vector<2x64xf32>
    %c351 = arith.constant 351 : index
    %c0_67 = arith.constant 0 : index
    %324 = vector.load %arg0[%c351, %c0_67] : memref<360x128xf32, #tpu.memory_space<vmem>>, vector<1x64xf32>
    %325 = vector.broadcast %324 : vector<1x64xf32> to vector<2x64xf32>
    %326 = arith.addf %323, %325 : vector<2x64xf32>
    %cst_68 = arith.constant 0.000000e+00 : f32
    %327 = vector.broadcast %cst_68 : f32 to vector<2x64xf32>
    %328 = arith.maximumf %326, %327 : vector<2x64xf32>
    %cst_69 = arith.constant dense<0.000000e+00> : vector<2x16xf32>
    %329 = tpu.matmul %328, %309, %cst_69 {dimension_numbers = #tpu.dot_dimension_numbers<[1], [0], [0], [1], [0, 0, 1, 1], [], []>} : vector<2x64xf32>, vector<64x16xf32>, vector<2x16xf32> -> vector<2x16xf32>
    %c352 = arith.constant 352 : index
    %c0_70 = arith.constant 0 : index
    %330 = vector.load %arg0[%c352, %c0_70] : memref<360x128xf32, #tpu.memory_space<vmem>>, vector<1x16xf32>
    %331 = vector.broadcast %330 : vector<1x16xf32> to vector<2x16xf32>
    %332 = arith.addf %329, %331 : vector<2x16xf32>
    %c0_71 = arith.constant 0 : index
    %c0_72 = arith.constant 0 : index
    %333 = vector.load %arg2[%c0_71, %c0_72] : memref<2x16xf32, #tpu.memory_space<vmem>>, vector<2x16xf32>
    tpu.vector_store %arg2[%c0_71, %c0_72], %332 {strides = array<i32>} : memref<2x16xf32, #tpu.memory_space<vmem>>, vector<2x16xf32>,
    return
  }
}

</mosaic_0001>

<bundles_post_ra>
// kernel: base_model_forward.1
= control target key start
LH: loop header
LB: loop body
LE: loop exit
PB: predicated region body
PF: predicated region fallthrough
CT: control target
= control target key end

     0   :  { %7 = vsyncpa [#allocation3], 0  ;;  %s2687_s0 = inlined_call_operand.hbm [shape: f32[360,128], index: 0, kind: input, shape index: {}]   ;;  %s2688_s1 = inlined_call_operand.vmem [shape: f32[16,33], index: 1, kind: input, shape index: {}]   ;;  %s2689_s2 = inlined_call_operand.hbm [shape: f32[2,16], index: 2, kind: output, shape index: {}]  }
   0x1   :  { %8 = vsyncpa [#allocation4], 0  ;;  %s2416_s9 = smov [#allocation2]   ;;  %s2368_s13 = scalar_lea.hbm %s2687_s0, 5760 }
   0x2   :  { %s14_s10 = sshll.u32 %s2416_s9, 4  ;;  %p2369_p0 = scmp.ne.s32.totalorder %s2687_s0, %s2368_s13  ;;  %s15_s10 = int_to_ptr.vmem [resolvable:$true] %s14_s10 }
   0x3   :  { %p2372_p1 = scmp.lt.u32.totalorder %s2368_s13, %s2687_s0 }
   0x5   :  { %p2374_p2 = pnand %p2372_p1, %p2369_p0 }
   0x7   :  { %2377 = shalt.err (!%p2374_p2)
}
   0x8   :  { %s2378_s18 = scalar_lea.vmem %s15_s10, 5760  ;;  %p2383_p4 = scmp.lt.s32.totalorder %s15_s10, %s15_s10 }
   0x9   :  { %p2379_p3 = scmp.ne.s32.totalorder %s15_s10, %s2378_s18  ;;  %p2384_p5 = scmp.lt.s32.totalorder %s2378_s18, %s2378_s18 }
   0xb   :  { %p2385_p6 = por %p2384_p5, %p2383_p4 }
   0xd   :  { %p2386_p7 = pnand %p2385_p6, %p2379_p3 }
   0xf   :  { %2389 = shalt.err (!%p2386_p7)
}
  0x10   :  { %s2417_s19 = smov 128   ;;  %s2418_s20 = smov 8  }
  0x11   :  { %20 = dma.hbm_to_vmem [thread:$0]  %s2687_s0, 5760, %s15_s10, [#allocation3], %s2417_s19, %s2417_s19, %s2418_s20  }
  0x12   :  { %2412 = dma.done.wait [#allocation3], 5760  }
  0x13   :  { %2413 = vsyncadd [#allocation3], 4294961536  ;;  %v2419_v0 = vmov 32   ;;  %v2458_v1 = vld [vmem:[%s2688_s1] sm:$0xff]  ;;  %v2463_v2 = vld [vmem:[%s2688_s1 + $0x8] sm:$0xff]  ;;  %v30_v23 = vlaneseq  ;;  %vm51_vm0 = vcmask 457728  }
  0x14   :  { %2311 = vset.pattern.permute.xlu0 %v2419_v0  ;;  %v44_v3 = vld [vmem:[#allocation2] sm:$0xff]  ;;  %v2295_v4 = vtrunc.f32 %v2458_v1  ;;  %v2297_v5 = vtrunc.f32 %v2463_v2  ;;  %v45_v6 = vld [vmem:[#allocation2 + $0x8] sm:$0xff]  ;;  %v46_v7 = vld [vmem:[#allocation2 + $0x10] sm:$0xff]  ;;  %v2420_v26 = vmov 0.0   ;;  %v2421_v33 = vmov 0.0|0.0   ;;  %s2423_s0 = smov 64  }
  0x15   :  { %v47_v8 = vld [vmem:[#allocation2 + $0x18] sm:$0xff]  ;;  %v2180_v9 = vpack.c.bf16 %v45_v6, %v44_v3  ;;  %v48_v12 = vld [vmem:[#allocation2 + $0x20] sm:$0xff]  ;;  %v49_v13 = vld [vmem:[#allocation2 + $0x28] sm:$0xff]  ;;  %v2468_v24 = vand.u32 127, %v30_v23  ;;  %vm2422_vm3 = vmmov 0   ;;  %vm146_vm4 = vcmask 261120  }
  0x16   :  { %v2184_v10 = vpack.c.bf16 %v47_v8, %v46_v7  ;;  %v2296_v11 = vcvt.f32.s32 %v2295_v4  ;;  %v2298_v14 = vcvt.f32.s32 %v2297_v5  ;;  %v2188_v15 = vpack.c.bf16 %v49_v13, %v48_v12  ;;  %v50_v16 = vld [vmem:[#allocation2 + $0x30] sm:$0xff]  ;;  %v133_v17 = vld [vmem:[#allocation2 + $0x38] sm:$0xff]  ;;  %v134_v18 = vld [vmem:[#allocation2 + $0x40] sm:$0xff]  ;;  %s2424_s1 = smov 96   ;;  %s2427_s27 = smov [#allocation5]  }
  0x17   :  { %2181 = vmatprep.subr.bf16.mxu0 %v2180_v9  ;;  %v135_v19 = vld [vmem:[#allocation2 + $0x48] sm:$0xff]  ;;  %v2192_v20 = vpack.c.bf16 %v134_v18, %v133_v17  ;;  %v136_v21 = vld [vmem:[#allocation2 + $0x50] sm:$0xff]  ;;  %v137_v30 = vld [vmem:[#allocation2 + $0x58] sm:$0xff]  ;;  %vm1328_vm5 = vcmask 1041409   ;;  %vm1331_vm6 = vcmask 58368   ;;  %vm1424_vm9 = vcmask 64512  }
  0x18   :  { %33 = vperm.xlu0 %2311, %v2296_v11   ;;  %2183 = vmatpush3.bf16.msra.mxu0 %v2180_v9  ;;  %v2196_v22 = vpack.c.bf16 %v136_v21, %v135_v19  ;;  %v138_v31 = vld [vmem:[#allocation2 + $0x60] sm:$0xff]  ;;  %v139_v34 = vld [vmem:[#allocation2 + $0x68] sm:$0xff]  ;;  %v140_v35 = vld [vmem:[#allocation2 + $0x70] sm:$0xff]  ;;  %vm1427_vm11 = vcmask 130048   ;;  %vm1761_vm12 = vcmask 523264   ;;  %s1843_s28 = sshll.u32 %s2427_s27, 4  ;;  %s1844_s28 = int_to_ptr.vmem [resolvable:$true] %s1843_s28 }
  0x19   :  { %2185 = vmatprep.subr.bf16.mxu0 %v2184_v10  ;;  %2193 = vmatprep.subr.bf16.mxu1 %v2192_v20  ;;  %v2474_v32 = vpack.c.bf16 %v138_v31, %v137_v30  ;;  %v2480_v36 = vpack.c.bf16 %v140_v35, %v139_v34  ;;  %v1860_v37 = vld [vmem:[#allocation2 + $0x159] ss:$0 sm:$0xff]  ;;  %v1856_v40 = vld [vmem:[#allocation2 + $0x158] ss:$0 sm:$0xff]  ;;  %vm1835_vm13 = vcmask 123904   ;;  %s2390_s29 = scalar_lea.vmem %s1844_s28, 32  ;;  %p2395_p9 = scmp.lt.s32.totalorder %s1844_s28, %s1844_s28 }
  0x1a   :  { %2195 = vmatpush3.bf16.msra.mxu1 %v2192_v20  ;;  %314 = vrot.lane.b32.xlu1 %v1860_v37, %s2423_s0  ;;  %p2391_p8 = scmp.ne.s32.totalorder %s1844_s28, %s2390_s29  ;;  %p2396_p10 = scmp.lt.s32.totalorder %s2390_s29, %s2390_s29 }
  0x1b   :  { %2197 = vmatprep.subr.bf16.mxu1 %v2196_v22 }
  0x1c   :  { %36 = vperm.xlu0 %2311, %v2298_v14   ;;  %2187 = vmatpush3.bf16.msra.mxu0 %v2184_v10  ;;  %p2397_p11 = por %p2396_p10, %p2395_p9 }
  0x1d   :  { %2189 = vmatprep.subr.bf16.mxu0 %v2188_v15 }
  0x1e   :  { %2199 = vmatpush3.bf16.msra.mxu1 %v2196_v22  ;;  %p2398_p12 = pnand %p2397_p11, %p2391_p8 }
  0x1f   :  { %2200 = vmatprep.subr.bf16.mxu1 %v2421_v33 }
  0x20   :  { %2191 = vmatpush3.bf16.msra.mxu0 %v2188_v15 }
  0x21   :  { %1995 = vmatprep.subr.mxu0 %v50_v16 }
  0x24   :  { %1996 = vmatpush3.msra.mxu0 %v50_v16 }
  0x25   :  { %2218 = vmatprep.subr.bf16.mxu0 %v2421_v33 }
  0x8c   :  { %v2504_v44 = vpop.permute.xlu1 %314 }
  0x97   :  { %v34_v25 = vpop.permute.xlu0 %33 }
  0x98   :  { %vm38_vm1 = vcmp.eq.s32.totalorder %v2468_v24, %v34_v25 }
  0x99   :  { %v1852_v27 = vsel %vm38_vm1, 1.0, %v2420_v26 }
  0x9a   :  { %1997 = vmatprep.mubr.msk.f32.mxu0 %vm51_vm0, %v1852_v27 }
  0x9b   :  { %v37_v28 = vpop.permute.xlu0 %36 }
  0x9c   :  { %vm39_vm2 = vcmp.eq.s32.totalorder %v2468_v24, %v37_v28 }
  0x9d   :  { %v1853_v29 = vsel %vm39_vm2, 1.0, %v2420_v26 }
  0x9e   :  { %1998 = vmatmul.mubr.msk.f32.vlgmr.msra.gmra.mrb[0].mxu0 %vm51_vm0, %v1853_v29 }
  0x9f   :  { %2220 = vmatpush3.bf16.msra.mxu0 %v2474_v32  ;;  %2052 = vmatprep.mubr.msk.f32.mxu0 %vm2422_vm3, %v2420_v26 }
  0xa0   :  { %2221 = vmatprep.subr.bf16.mxu0 %v2421_v33 }
  0xa3   :  { %2223 = vmatpush3.bf16.msra.mxu0 %v2480_v36 }
  0xa4   :  { %2230 = vmatprep.subr.bf16.mxu0 %v2421_v33 }
 0x171   :  { %v1999_v38 = vpop.f32.mrb[0].mxu0 }
 0x172   :  { %v124_v39 = vpop.f32.mrb[1].mxu0 }
 0x173   :  { %2008 = vmatprep.mubr.msk.f32.mxu1 %vm146_vm4, %v124_v39 }
 0x174   :  { %2009 = vmatmul.mubr.msk.f32.vlgmr.msra.gmra.mrb[0].mxu1 %vm146_vm4, %v1999_v38 }
 0x175   :  { %2202 = vmatpush3.bf16.msra.mxu1 %v2474_v32  ;;  %2019 = vmatprep.mubr.msk.f32.mxu1 %vm2422_vm3, %v2420_v26 }
 0x176   :  { %2203 = vmatprep.subr.bf16.mxu1 %v2421_v33 }
 0x179   :  { %2205 = vmatpush3.bf16.msra.mxu1 %v2480_v36 }
 0x17a   :  { %2206 = vmatprep.subr.bf16.mxu1 %v2421_v33 }
 0x17c   :  { %2020 = vmatmul.mubr.f32.vlgmr.msra.gmra.mrb[2].mxu1 %v2420_v26 }
 0x17d   :  { %2208 = vmatpush3.bf16.msra.mxu1 %v2474_v32  ;;  %2030 = vmatprep.mubr.msk.f32.mxu1 %vm2422_vm3, %v2420_v26 }
 0x17e   :  { %2209 = vmatprep.subr.bf16.mxu1 %v2421_v33 }
 0x181   :  { %2211 = vmatpush3.bf16.msra.mxu1 %v2480_v36 }
 0x182   :  { %2212 = vmatprep.subr.bf16.mxu1 %v2421_v33 }
 0x247   :  { %v2010_v41 = vpop.f32.mrb[0].mxu1 }
 0x248   :  { %v2502_v42 = vadd.f32 %v2010_v41, %v1856_v40  ;;  %v219_v43 = vpop.f32.mrb[1].mxu1 }
 0x249   :  { %v2508_v48 = vadd.f32 %v1856_v40, %v219_v43 }
 0x24f   :  { %v298_v45 = vpop.f32.mrb[2].mxu1 }
 0x250   :  { %v317_v46 = vadd.f32 %v2504_v44, %v298_v45  ;;  %v2021_v47 = vpop.f32.mrb[3].mxu1  ;;  %v302_v49 = vadd.f32 %v298_v45, %v2508_v48 }
 0x252   :  { %319 = vrot.lane.b32.xlu1 %v317_v46, %s2423_s0  ;;  %v1859_v50 = vmul.f32 -1.442695, %v302_v49 }
 0x254   :  { %2314 = vpow2.f32 %v1859_v50 }
 0x25e   :  { %v2315_v51 = vpop.eup %2314 }
 0x25f   :  { %v306_v52 = vadd.f32 1.0, %v2315_v51 }
 0x261   :  { %2316 = vrcp.f32 %v306_v52 }
 0x26b   :  { %v2317_v53 = vpop.eup %2316 }
 0x26c   :  { %v329_v59 = vsub.f32 1.0, %v2317_v53  ;;  %v335_v61 = vmul.f32 0.0, %v2317_v53 }
 0x2c4   :  { %v320_v54 = vpop.permute.xlu1 %319 }
 0x2c5   :  { %v322_v55 = vmul.f32 %v2317_v53, %v320_v54 }
 0x2c7   :  { %324 = vrot.lane.b32.xlu0 %v322_v55, %s2423_s0 }
 0x339   :  { %v325_v56 = vpop.permute.xlu0 %324 }
 0x33a   :  { %v327_v57 = vadd.f32 %v325_v56, %v2508_v48 }
 0x33c   :  { %2318 = vtanh.f32 %v327_v57 }
 0x346   :  { %v2319_v58 = vpop.eup %2318 }
 0x347   :  { %331 = vrot.lane.b32.xlu1 %v2319_v58, %s2424_s1 }
 0x3b9   :  { %v332_v60 = vpop.permute.xlu1 %331 }
 0x3ba   :  { %v334_v62 = vmul.f32 %v332_v60, %v329_v59 }
 0x3bc   :  { %v336_v63 = vadd.f32 %v335_v61, %v334_v62 }
 0x3be   :  { %338 = vrot.lane.b32.xlu0 %v336_v63, %s2424_s1  ;;  %v441_v18 = vrot.slane %v336_v63, 6 }
 0x430   :  { %v339_v0 = vpop.permute.xlu0 %338 }
 0x431   :  { %2031 = vmatmul.mubr.msk.f32.vlgmr.msra.gmra.mrb[4].mxu1 %vm146_vm4, %v339_v0 }
 0x432   :  { %2214 = vmatpush3.bf16.msra.mxu1 %v2474_v32  ;;  %2041 = vmatprep.mubr.msk.f32.mxu1 %vm2422_vm3, %v2420_v26 }
 0x433   :  { %2215 = vmatprep.subr.bf16.mxu1 %v2421_v33 }
 0x436   :  { %2217 = vmatpush3.bf16.msra.mxu1 %v2480_v36 }
 0x437   :  { %2224 = vmatprep.subr.bf16.mxu1 %v2421_v33 }
 0x504   :  { %v408_v3 = vpop.f32.mrb[4].mxu1 }
 0x505   :  { %v422_v4 = vadd.f32 %v408_v3, %v2504_v44  ;;  %v2032_v5 = vpop.f32.mrb[5].mxu1  ;;  %v413_v7 = vrot.slane %v408_v3, 6 }
 0x507   :  { %v424_v6 = vrot.slane %v422_v4, 6  ;;  %v415_v8 = vadd.f32 %v413_v7, %v2508_v48 }
 0x509   :  { %425 = vrot.lane.b32.xlu1 %v424_v6, %s2423_s0  ;;  %v1862_v9 = vmul.f32 -1.442695, %v415_v8 }
 0x50b   :  { %2320 = vpow2.f32 %v1862_v9 }
 0x515   :  { %v2321_v10 = vpop.eup %2320 }
 0x516   :  { %v419_v11 = vadd.f32 1.0, %v2321_v10 }
 0x518   :  { %2322 = vrcp.f32 %v419_v11 }
 0x522   :  { %v2323_v12 = vpop.eup %2322 }
 0x523   :  { %v435_v19 = vsub.f32 1.0, %v2323_v12  ;;  %v443_v22 = vmul.f32 %v2323_v12, %v441_v18 }
 0x57b   :  { %v426_v13 = vpop.permute.xlu1 %425 }
 0x57c   :  { %v428_v14 = vmul.f32 %v2323_v12, %v426_v13 }
 0x57e   :  { %430 = vrot.lane.b32.xlu0 %v428_v14, %s2423_s0 }
 0x5f0   :  { %v431_v15 = vpop.permute.xlu0 %430 }
 0x5f1   :  { %v433_v16 = vadd.f32 %v431_v15, %v2508_v48 }
 0x5f3   :  { %2324 = vtanh.f32 %v433_v16 }
 0x5fd   :  { %v2325_v17 = vpop.eup %2324 }
 0x5fe   :  { %437 = vrot.lane.b32.xlu1 %v2325_v17, %s2424_s1 }
 0x670   :  { %v438_v20 = vpop.permute.xlu1 %437 }
 0x671   :  { %v440_v21 = vmul.f32 %v438_v20, %v435_v19 }
 0x673   :  { %v444_v25 = vadd.f32 %v443_v22, %v440_v21 }
 0x675   :  { %v446_v27 = vrot.slane %v444_v25, 2  ;;  %v550_v50 = vrot.slane %v444_v25, 6 }
 0x677   :  { %447 = vrot.lane.b32.xlu0 %v446_v27, %s2424_s1 }
 0x6e9   :  { %v448_v28 = vpop.permute.xlu0 %447 }
 0x6ea   :  { %2042 = vmatmul.mubr.msk.f32.vlgmr.msra.gmra.mrb[6].mxu1 %vm146_vm4, %v448_v28 }
 0x6eb   :  { %2226 = vmatpush3.bf16.msra.mxu1 %v2474_v32  ;;  %2063 = vmatprep.mubr.msk.f32.mxu1 %vm2422_vm3, %v2420_v26 }
 0x6ec   :  { %2227 = vmatprep.subr.bf16.mxu1 %v2421_v33 }
 0x6ef   :  { %2229 = vmatpush3.bf16.msra.mxu1 %v2480_v36 }
 0x6f0   :  { %2236 = vmatprep.subr.bf16.mxu1 %v2421_v33 }
 0x7bd   :  { %v517_v29 = vpop.f32.mrb[6].mxu1 }
 0x7be   :  { %v531_v30 = vadd.f32 %v517_v29, %v2504_v44  ;;  %v2043_v31 = vpop.f32.mrb[7].mxu1  ;;  %v522_v35 = vrot.slane %v517_v29, 4 }
 0x7c0   :  { %v533_v34 = vrot.slane %v531_v30, 4  ;;  %v524_v37 = vadd.f32 %v522_v35, %v2508_v48 }
 0x7c2   :  { %534 = vrot.lane.b32.xlu1 %v533_v34, %s2423_s0  ;;  %v1864_v38 = vmul.f32 -1.442695, %v524_v37 }
 0x7c4   :  { %2326 = vpow2.f32 %v1864_v38 }
 0x7ce   :  { %v2327_v39 = vpop.eup %2326 }
 0x7cf   :  { %v528_v40 = vadd.f32 1.0, %v2327_v39 }
 0x7d1   :  { %2328 = vrcp.f32 %v528_v40 }
 0x7db   :  { %v2329_v41 = vpop.eup %2328 }
 0x7dc   :  { %v544_v51 = vsub.f32 1.0, %v2329_v41  ;;  %v552_v53 = vmul.f32 %v2329_v41, %v550_v50 }
 0x834   :  { %v535_v43 = vpop.permute.xlu1 %534 }
 0x835   :  { %v537_v45 = vmul.f32 %v2329_v41, %v535_v43 }
 0x837   :  { %539 = vrot.lane.b32.xlu0 %v537_v45, %s2423_s0 }
 0x8a9   :  { %v540_v46 = vpop.permute.xlu0 %539 }
 0x8aa   :  { %v542_v47 = vadd.f32 %v540_v46, %v2508_v48 }
 0x8ac   :  { %2330 = vtanh.f32 %v542_v47 }
 0x8b6   :  { %v2331_v49 = vpop.eup %2330 }
 0x8b7   :  { %546 = vrot.lane.b32.xlu1 %v2331_v49, %s2424_s1 }
 0x929   :  { %v547_v52 = vpop.permute.xlu1 %546 }
 0x92a   :  { %v549_v54 = vmul.f32 %v547_v52, %v544_v51 }
 0x92c   :  { %v553_v55 = vadd.f32 %v552_v53, %v549_v54 }
 0x92e   :  { %v555_v56 = vrot.slane %v553_v55, 4  ;;  %v659_v11 = vrot.slane %v553_v55, 6 }
 0x930   :  { %556 = vrot.lane.b32.xlu0 %v555_v56, %s2424_s1 }
 0x9a2   :  { %v557_v57 = vpop.permute.xlu0 %556 }
 0x9a3   :  { %2053 = vmatmul.mubr.msk.f32.vlgmr.msra.gmra.mrb[2].mxu0 %vm146_vm4, %v557_v57 }
 0x9a4   :  { %2232 = vmatpush3.bf16.msra.mxu0 %v2474_v32  ;;  %2074 = vmatprep.mubr.msk.f32.mxu0 %vm2422_vm3, %v2420_v26 }
 0x9a5   :  { %2233 = vmatprep.subr.bf16.mxu0 %v2421_v33 }
 0x9a8   :  { %2235 = vmatpush3.bf16.msra.mxu0 %v2480_v36 }
 0x9a9   :  { %2242 = vmatprep.subr.bf16.mxu0 %v2421_v33 }
 0xa76   :  { %v626_v58 = vpop.f32.mrb[2].mxu0 }
 0xa77   :  { %v640_v59 = vadd.f32 %v626_v58, %v2504_v44  ;;  %v2054_v60 = vpop.f32.mrb[3].mxu0  ;;  %v631_v62 = vrot.slane %v626_v58, 2 }
 0xa79   :  { %v642_v61 = vrot.slane %v640_v59, 2  ;;  %v633_v63 = vadd.f32 %v631_v62, %v2508_v48 }
 0xa7b   :  { %643 = vrot.lane.b32.xlu1 %v642_v61, %s2423_s0  ;;  %v1866_v0 = vmul.f32 -1.442695, %v633_v63 }
 0xa7d   :  { %2332 = vpow2.f32 %v1866_v0 }
 0xa87   :  { %v2333_v3 = vpop.eup %2332 }
 0xa88   :  { %v637_v4 = vadd.f32 1.0, %v2333_v3 }
 0xa8a   :  { %2334 = vrcp.f32 %v637_v4 }
 0xa94   :  { %v2335_v5 = vpop.eup %2334 }
 0xa95   :  { %v653_v12 = vsub.f32 1.0, %v2335_v5  ;;  %v661_v14 = vmul.f32 %v2335_v5, %v659_v11 }
 0xaed   :  { %v644_v6 = vpop.permute.xlu1 %643 }
 0xaee   :  { %v646_v7 = vmul.f32 %v2335_v5, %v644_v6 }
 0xaf0   :  { %648 = vrot.lane.b32.xlu0 %v646_v7, %s2423_s0 }
 0xb62   :  { %v649_v8 = vpop.permute.xlu0 %648 }
 0xb63   :  { %v651_v9 = vadd.f32 %v649_v8, %v2508_v48 }
 0xb65   :  { %2336 = vtanh.f32 %v651_v9 }
 0xb6f   :  { %v2337_v10 = vpop.eup %2336 }
 0xb70   :  { %655 = vrot.lane.b32.xlu1 %v2337_v10, %s2424_s1 }
 0xbe2   :  { %v656_v13 = vpop.permute.xlu1 %655 }
 0xbe3   :  { %v658_v15 = vmul.f32 %v656_v13, %v653_v12 }
 0xbe5   :  { %v662_v16 = vadd.f32 %v661_v14, %v658_v15 }
 0xbe7   :  { %v664_v17 = vrot.slane %v662_v16, 6 }
 0xbe9   :  { %665 = vrot.lane.b32.xlu0 %v664_v17, %s2424_s1 }
 0xc5b   :  { %v666_v18 = vpop.permute.xlu0 %665 }
 0xc5c   :  { %2064 = vmatmul.mubr.msk.f32.vlgmr.msra.gmra.mrb[8].mxu1 %vm146_vm4, %v666_v18 }
 0xc5d   :  { %2238 = vmatpush3.bf16.msra.mxu1 %v2474_v32  ;;  %2085 = vmatprep.mubr.msk.f32.mxu1 %vm2422_vm3, %v2420_v26 }
 0xc5e   :  { %2239 = vmatprep.subr.bf16.mxu1 %v2421_v33 }
 0xc61   :  { %2241 = vmatpush3.bf16.msra.mxu1 %v2480_v36 }
 0xd2f   :  { %v735_v48 = vpop.f32.mrb[8].mxu1 }
 0xd30   :  { %v746_v19 = vadd.f32 %v735_v48, %v2504_v44  ;;  %v2065_v20 = vpop.f32.mrb[9].mxu1  ;;  %v739_v21 = vadd.f32 %v735_v48, %v2502_v42 }
 0xd32   :  { %748 = vrot.lane.b32.xlu1 %v746_v19, %s2423_s0  ;;  %v1868_v22 = vmul.f32 -1.442695, %v739_v21 }
 0xd34   :  { %2338 = vpow2.f32 %v1868_v22 }
 0xd3e   :  { %v2339_v25 = vpop.eup %2338 }
 0xd3f   :  { %v743_v27 = vadd.f32 1.0, %v2339_v25 }
 0xd41   :  { %2340 = vrcp.f32 %v743_v27 }
 0xd4b   :  { %v2341_v28 = vpop.eup %2340 }
 0xd4c   :  { %v758_v37 = vsub.f32 1.0, %v2341_v28  ;;  %v765_v39 = vmul.f32 %v2341_v28, %v664_v17 }
 0xda4   :  { %v749_v29 = vpop.permute.xlu1 %748 }
 0xda5   :  { %v751_v30 = vmul.f32 %v2341_v28, %v749_v29 }
 0xda7   :  { %753 = vrot.lane.b32.xlu0 %v751_v30, %s2423_s0 }
 0xe19   :  { %v754_v31 = vpop.permute.xlu0 %753 }
 0xe1a   :  { %v756_v34 = vadd.f32 %v754_v31, %v2502_v42 }
 0xe1c   :  { %2342 = vtanh.f32 %v756_v34 }
 0xe26   :  { %v2343_v35 = vpop.eup %2342 }
 0xe27   :  { %760 = vrot.lane.b32.xlu1 %v2343_v35, %s2424_s1 }
 0xe99   :  { %v761_v38 = vpop.permute.xlu1 %760 }
 0xe9a   :  { %v763_v40 = vmul.f32 %v761_v38, %v758_v37 }
 0xe9c   :  { %v766_v41 = vadd.f32 %v765_v39, %v763_v40 }
 0xe9e   :  { %768 = vrot.lane.b32.xlu0 %v766_v41, %s2424_s1  ;;  %v871_v59 = vrot.slane %v766_v41, 6 }
 0xf10   :  { %v769_v43 = vpop.permute.xlu0 %768 }
 0xf11   :  { %2075 = vmatmul.mubr.msk.f32.vlgmr.msra.gmra.mrb[4].mxu0 %vm146_vm4, %v769_v43 }
 0xf12   :  { %2244 = vmatpush3.bf16.msra.mxu0 %v2474_v32  ;;  %2096 = vmatprep.mubr.msk.f32.mxu0 %vm2422_vm3, %v2420_v26 }
 0xf13   :  { %2245 = vmatprep.subr.bf16.mxu0 %v2421_v33 }
 0xf16   :  { %2247 = vmatpush3.bf16.msra.mxu0 %v2480_v36 }
 0xf17   :  { %2256 = vmatprep.subr.bf16.mxu0 %v2421_v33 }
 0xfe4   :  { %v838_v45 = vpop.f32.mrb[4].mxu0 }
 0xfe5   :  { %v852_v46 = vadd.f32 %v838_v45, %v2504_v44  ;;  %v2076_v47 = vpop.f32.mrb[5].mxu0  ;;  %v843_v50 = vrot.slane %v838_v45, 6 }
 0xfe7   :  { %v854_v49 = vrot.slane %v852_v46, 6  ;;  %v845_v51 = vadd.f32 %v843_v50, %v2502_v42  ;;  %v1094_v50 = vld [vmem:[#allocation2 + $0x80] sm:$0xff] }
 0xfe9   :  { %855 = vrot.lane.b32.xlu1 %v854_v49, %s2423_s0  ;;  %v1870_v32 = vmul.f32 -1.442695, %v845_v51  ;;  %v1093_v49 = vld [vmem:[#allocation2 + $0x78] sm:$0xff]  ;;  %v1095_v51 = vld [vmem:[#allocation2 + $0x88] sm:$0xff] }
 0xfeb   :  { %2344 = vpow2.f32 %v1870_v32  ;;  %v2248_v32 = vpack.c.bf16 %v1094_v50, %v1093_v49 }
 0xfed   :  { %2249 = vmatprep.subr.bf16.mxu1 %v2248_v32 }
 0xff5   :  { %v2345_v52 = vpop.eup %2344 }
 0xff6   :  { %v849_v53 = vadd.f32 1.0, %v2345_v52  ;;  %v1096_v52 = vld [vmem:[#allocation2 + $0x90] sm:$0xff] }
 0xff8   :  { %2346 = vrcp.f32 %v849_v53  ;;  %v1097_v53 = vld [vmem:[#allocation2 + $0x98] sm:$0xff] }
0x1002   :  { %v2347_v54 = vpop.eup %2346 }
0x1003   :  { %v865_v60 = vsub.f32 1.0, %v2347_v54  ;;  %v873_v63 = vmul.f32 %v2347_v54, %v871_v59  ;;  %v1501_v59 = vld [vmem:[#allocation2 + $0xb8] sm:$0xff] }
0x105b   :  { %v856_v55 = vpop.permute.xlu1 %855 }
0x105c   :  { %v858_v36 = vmul.f32 %v2347_v54, %v856_v55  ;;  %v1098_v54 = vld [vmem:[#allocation2 + $0xa0] sm:$0xff]  ;;  %v2252_v55 = vpack.c.bf16 %v1096_v52, %v1095_v51 }
0x105e   :  { %860 = vrot.lane.b32.xlu0 %v858_v36, %s2423_s0  ;;  %v2257_v36 = vpack.c.bf16 %v1098_v54, %v1097_v53  ;;  %v2426_v54 = vmov 0  }
0x105f   :  { %2312 = vset.pattern.permute.xlu1 %v2426_v54  ;;  %2313 = vset.pattern.permute.xlu0 %v2426_v54 }
0x10d0   :  { %v861_v56 = vpop.permute.xlu0 %860 }
0x10d1   :  { %v863_v57 = vadd.f32 %v861_v56, %v2502_v42  ;;  %v1099_v56 = vld [vmem:[#allocation2 + $0xa8] sm:$0xff] }
0x10d3   :  { %2348 = vtanh.f32 %v863_v57  ;;  %v1100_v57 = vld [vmem:[#allocation2 + $0xb0] sm:$0xff] }
0x10dd   :  { %v2349_v58 = vpop.eup %2348 }
0x10de   :  { %867 = vrot.lane.b32.xlu1 %v2349_v58, %s2424_s1  ;;  %v2260_v58 = vpack.c.bf16 %v1100_v57, %v1099_v56 }
0x1150   :  { %v868_v61 = vpop.permute.xlu1 %867 }
0x1151   :  { %v870_v62 = vmul.f32 %v868_v61, %v865_v60  ;;  %v1502_v60 = vld [vmem:[#allocation2 + $0xc0] sm:$0xff] }
0x1152   :  { %v2266_v61 = vpack.c.bf16 %v1502_v60, %v1501_v59 }
0x1153   :  { %v874_v0 = vadd.f32 %v873_v63, %v870_v62  ;;  %v1503_v62 = vld [vmem:[#allocation2 + $0xc8] sm:$0xff]  ;;  %v1504_v63 = vld [vmem:[#allocation2 + $0xd0] sm:$0xff] }
0x1155   :  { %v876_v3 = vrot.slane %v874_v0, 2  ;;  %v980_v19 = vrot.slane %v874_v0, 6  ;;  %v2269_v0 = vpack.c.bf16 %v1504_v63, %v1503_v62 }
0x1157   :  { %877 = vrot.lane.b32.xlu0 %v876_v3, %s2424_s1 }
0x11c9   :  { %v878_v4 = vpop.permute.xlu0 %877 }
0x11ca   :  { %2086 = vmatmul.mubr.msk.f32.vlgmr.msra.gmra.mrb[10].mxu1 %vm146_vm4, %v878_v4 }
0x11cb   :  { %2107 = vmatprep.mubr.msk.f32.mxu1 %vm146_vm4, %v2458_v1  ;;  %2251 = vmatpush3.bf16.msra.mxu1 %v2248_v32 }
0x11cc   :  { %2253 = vmatprep.subr.bf16.mxu1 %v2252_v55 }
0x11cf   :  { %2255 = vmatpush3.bf16.msra.mxu1 %v2252_v55 }
0x11d0   :  { %2265 = vmatprep.subr.bf16.mxu1 %v2421_v33 }
0x11d2   :  { %2108 = vmatmul.mubr.msk.f32.vlgmr.msra.gmra.mrb[12].mxu1 %vm146_vm4, %v2463_v2 }
0x11d3   :  { %2267 = vmatpush3.bf16.msra.mxu1 %v2266_v61  ;;  %2136 = vmatprep.mubr.msk.f32.mxu1 %vm2422_vm3, %v2420_v26 }
0x11d4   :  { %2268 = vmatprep.subr.bf16.mxu1 %v2421_v33 }
0x11d7   :  { %2270 = vmatpush3.bf16.msra.mxu1 %v2269_v0 }
0x11d8   :  { %2277 = vmatprep.subr.bf16.mxu1 %v2421_v33 }
0x129d   :  { %v947_v5 = vpop.f32.mrb[10].mxu1 }
0x129e   :  { %v961_v6 = vadd.f32 %v947_v5, %v2504_v44  ;;  %v2087_v7 = vpop.f32.mrb[11].mxu1  ;;  %v952_v9 = vrot.slane %v947_v5, 4 }
0x12a0   :  { %v963_v8 = vrot.slane %v961_v6, 4  ;;  %v954_v10 = vadd.f32 %v952_v9, %v2502_v42 }
0x12a2   :  { %964 = vrot.lane.b32.xlu1 %v963_v8, %s2423_s0  ;;  %v1872_v11 = vmul.f32 -1.442695, %v954_v10 }
0x12a4   :  { %2350 = vpow2.f32 %v1872_v11 }
0x12a5   :  { %v2109_v10 = vpop.f32.mrb[12].mxu1 }
0x12a6   :  { %v1178_v11 = vpop.f32.mrb[13].mxu1 }
0x12ae   :  { %v2351_v12 = vpop.eup %2350 }
0x12af   :  { %v958_v13 = vadd.f32 1.0, %v2351_v12  ;;  %v2263_v12 = vpack.c.bf16 %v2463_v2, %v2458_v1 }
0x12b1   :  { %2352 = vrcp.f32 %v958_v13 }
0x12bb   :  { %v2353_v14 = vpop.eup %2352 }
0x12bc   :  { %v974_v20 = vsub.f32 1.0, %v2353_v14  ;;  %v982_v22 = vmul.f32 %v2353_v14, %v980_v19 }
0x1314   :  { %v965_v15 = vpop.permute.xlu1 %964 }
0x1315   :  { %v967_v16 = vmul.f32 %v2353_v14, %v965_v15  ;;  %v2425_v14 = vmov 1966171168  }
0x1316   :  { %v1279_v15 = vunpack.c.l.s4 %v2425_v14  ;;  %v1413_v14 = vadd.s32 4294967288, %v2468_v24 }
0x1317   :  { %969 = vrot.lane.b32.xlu0 %v967_v16, %s2423_s0  ;;  %v1878_v16 = vld [vmem:[#allocation2 + $0x15b] ss:$0 sm:$0xff] }
0x1318   :  { %v1280_v1 = vunpack.c.0.s8 %v1279_v15 }
0x1389   :  { %v970_v17 = vpop.permute.xlu0 %969 }
0x138a   :  { %v972_v18 = vadd.f32 %v970_v17, %v2502_v42  ;;  %v2627_v17 = vshrl.u32 %v30_v23, 7 }
0x138c   :  { %2354 = vtanh.f32 %v972_v18  ;;  %v1342_v55 = vsub.s32 1, %v2627_v17  ;;  %v1389_v15 = vmul.u32 8, %v2627_v17 }
0x138e   :  { %vm2647_vm7 = vcmp.ge.s32.totalorder %v2468_v24, %v1389_v15 }
0x1396   :  { %v2355_v48 = vpop.eup %2354 }
0x1397   :  { %976 = vrot.lane.b32.xlu1 %v2355_v48, %s2424_s1 }
0x1409   :  { %v977_v21 = vpop.permute.xlu1 %976 }
0x140a   :  { %v979_v25 = vmul.f32 %v977_v21, %v974_v20  ;;  %v1875_v21 = vld [vmem:[#allocation2 + $0x15a] ss:$0 sm:$0xff] }
0x140c   :  { %v2593_v27 = vadd.f32 %v982_v22, %v979_v25  ;;  %v1880_v22 = vld [vmem:[#allocation2 + $0x15c] ss:$0 sm:$0xff] }
0x140e   :  { %v985_v28 = vrot.slane %v2593_v27, 4  ;;  %v1089_v3 = vrot.slane %v2593_v27, 6  ;;  %v1283_v27 = vsub.s32 %v1280_v1, %v2627_v17 }
0x1410   :  { %986 = vrot.lane.b32.xlu0 %v985_v28, %s2424_s1  ;;  %v1179_v28 = vadd.f32 %v1875_v21, %v1178_v11 }
0x1412   :  { %v1187_v23 = vmax.f32 %v1179_v28, 0.0 }
0x1482   :  { %v987_v29 = vpop.permute.xlu0 %986 }
0x1483   :  { %2097 = vmatmul.mubr.msk.f32.vlgmr.msra.gmra.mrb[6].mxu0 %vm146_vm4, %v987_v29 }
0x1484   :  { %2118 = vmatprep.mubr.msk.f32.mxu0 %vm2422_vm3, %v2420_v26  ;;  %2258 = vmatpush3.bf16.msra.mxu0 %v2257_v36 }
0x1485   :  { %2259 = vmatprep.subr.bf16.mxu0 %v2421_v33 }
0x1488   :  { %2261 = vmatpush3.bf16.msra.mxu0 %v2260_v58 }
0x1489   :  { %2262 = vmatprep.subr.bf16.mxu0 %v2421_v33 }
0x1556   :  { %v1056_v30 = vpop.f32.mrb[6].mxu0 }
0x1557   :  { %v1070_v31 = vadd.f32 %v1056_v30, %v2504_v44  ;;  %v2098_v34 = vpop.f32.mrb[7].mxu0  ;;  %v1061_v37 = vrot.slane %v1056_v30, 2  ;;  %v1184_v30 = vadd.f32 %v2109_v10, %v1875_v21  ;;  %v1505_v21 = vld [vmem:[#allocation2 + $0xd8] sm:$0xff] }
0x1558   :  { %v1302_v34 = vsub.s32 0, %v2627_v17 }
0x1559   :  { %v1072_v35 = vrot.slane %v1070_v31, 2  ;;  %v1063_v38 = vadd.f32 %v1061_v37, %v2502_v42 }
0x155b   :  { %1073 = vrot.lane.b32.xlu1 %v1072_v35, %s2423_s0  ;;  %v1874_v39 = vmul.f32 -1.442695, %v1063_v38  ;;  %v1188_v38 = vmax.f32 %v1184_v30, 0.0 }
0x155d   :  { %2356 = vpow2.f32 %v1874_v39 }
0x1567   :  { %v2357_v40 = vpop.eup %2356 }
0x1568   :  { %v1067_v41 = vadd.f32 1.0, %v2357_v40 }
0x156a   :  { %2358 = vrcp.f32 %v1067_v41 }
0x1574   :  { %v2359_v43 = vpop.eup %2358 }
0x1575   :  { %v1083_v4 = vsub.f32 1.0, %v2359_v43  ;;  %v1091_v6 = vmul.f32 %v2359_v43, %v1089_v3 }
0x15cd   :  { %v1074_v45 = vpop.permute.xlu1 %1073 }
0x15ce   :  { %v1076_v46 = vmul.f32 %v2359_v43, %v1074_v45 }
0x15d0   :  { %1078 = vrot.lane.b32.xlu0 %v1076_v46, %s2423_s0 }
0x1642   :  { %v1079_v47 = vpop.permute.xlu0 %1078 }
0x1643   :  { %v1081_v44 = vadd.f32 %v1079_v47, %v2502_v42 }
0x1645   :  { %2360 = vtanh.f32 %v1081_v44  ;;  %v1322_v44 = vsub.s32 %v2468_v24, %v2627_v17 }
0x164f   :  { %v2361_v42 = vpop.eup %2360 }
0x1650   :  { %1085 = vrot.lane.b32.xlu1 %v2361_v42, %s2424_s1 }
0x16c2   :  { %v1086_v5 = vpop.permute.xlu1 %1085 }
0x16c3   :  { %v1088_v7 = vmul.f32 %v1086_v5, %v1083_v4 }
0x16c5   :  { %v1092_v8 = vadd.f32 %v1091_v6, %v1088_v7 }
0x16c7   :  { %v1195_v9 = vrot.slane %v1092_v8, 6 }
0x16c9   :  { %1196 = vrot.lane.b32.xlu0 %v1195_v9, %s2424_s1 }
0x173b   :  { %v1197_v13 = vpop.permute.xlu0 %1196 }
0x173c   :  { %2119 = vmatmul.mubr.msk.f32.vlgmr.msra.gmra.mrb[8].mxu0 %vm146_vm4, %v1197_v13  ;;  %2137 = vmatmul.mubr.msk.f32.vlgmr.msra.gmra.mrb[14].mxu1 %vm146_vm4, %v1197_v13  ;;  %v1391_v13 = vadd.s32 1, %v2627_v17 }
0x173d   :  { %2264 = vmatpush3.bf16.msra.mxu0 %v2263_v12  ;;  %2125 = vmatprep.mubr.msk.f32.mxu0 %vm2422_vm3, %v2420_v26 }
0x173e   :  { %2271 = vmatprep.subr.bf16.mxu0 %v2421_v33  ;;  %2158 = vmatprep.mubr.msk.f32.mxu1 %vm2422_vm3, %v2420_v26 }
0x180f   :  { %v1266_v2 = vpop.f32.mrb[8].mxu0  ;;  %v2629_v18 = vpop.f32.mrb[14].mxu1 }
0x1810   :  { %v1267_v48 = vadd.f32 %v1878_v16, %v1266_v2  ;;  %v2120_v19 = vpop.f32.mrb[9].mxu0  ;;  %v2138_v20 = vpop.f32.mrb[15].mxu1  ;;  %v1392_v16 = vmul.u32 8, %v1391_v13  ;;  %v1416_v2 = vsub.s32 %v1413_v14, %v2627_v17 }
0x1812   :  { %v1270_v25 = vmax.f32 %v1267_v48, 0.0  ;;  %vm2652_vm8 = vcmp.lt.s32.totalorder %v2468_v24, %v1392_v16 }
0x1813   :  { %vm1394_vm10 = vmand %vm2647_vm7, %vm2652_vm8 }
0x1814   :  { %v1276_v29 = vmul.f32 %v1880_v22, %v1270_v25  ;;  %v1506_v22 = vld [vmem:[#allocation2 + $0xe0] sm:$0xff] }
0x1815   :  { %v2272_v30 = vpack.c.bf16 %v1506_v22, %v1505_v21 }
0x1816   :  { %v1284_v31 = vrot.slane %v1276_v29, %v1283_v27 }
0x1818   :  { %v1285_v35 = vcombine.high %v1284_v31, %v1284_v31  ;;  %v1292_v37 = vrot.slane %v1284_v31, %v1283_v27 }
0x181a   :  { %v1303_v39 = vrot.slane %v1292_v37, %v1302_v34  ;;  %v1299_v40 = vrot.slane %v1285_v35, %v1283_v27 }
0x181c   :  { %v1310_v41 = vmul.f32 %v1303_v39, %v1187_v23  ;;  %v1307_v43 = vrot.slane %v1299_v40, %v1302_v34  ;;  %v1508_v23 = vld [vmem:[#allocation2 + $0xf0] sm:$0xff]  ;;  %v1509_v40 = vld [vmem:[#allocation2 + $0xf8] sm:$0xff] }
0x181e   :  { %v1312_v45 = vsel %vm146_vm4, %v1310_v41, 0.0  ;;  %v1311_v46 = vmul.f32 %v1307_v43, %v1188_v38  ;;  %v1510_v41 = vld [vmem:[#allocation2 + $0x100] sm:$0xff] }
0x181f   :  { %1313 = vadd.xlane.f32.xlu1 %v1312_v45  ;;  %v2278_v43 = vpack.c.bf16 %v1510_v41, %v1509_v40  ;;  %v1511_v45 = vld [vmem:[#allocation2 + $0x108] sm:$0xff] }
0x1820   :  { %v1315_v47 = vsel %vm146_vm4, %v1311_v46, 0.0  ;;  %v1512_v46 = vld [vmem:[#allocation2 + $0x110] sm:$0xff] }
0x1821   :  { %1316 = vadd.xlane.f32.xlu0 %v1315_v47  ;;  %2279 = vmatpush3.bf16.msra.mxu1 %v2278_v43  ;;  %v2281_v47 = vpack.c.bf16 %v1512_v46, %v1511_v45 }
0x1822   :  { %2280 = vmatprep.subr.bf16.mxu1 %v2421_v33 }
0x1825   :  { %2282 = vmatpush3.bf16.msra.mxu1 %v2281_v47 }
0x18ac   :  { %v1314_v49 = vpop.xlane.xlu1 %1313 }
0x18ad   :  { %v1323_v51 = vrot.slane %v1314_v49, %v1322_v44 }
0x18ae   :  { %v1317_v50 = vpop.xlane.xlu0 %1316 }
0x18af   :  { %v1327_v32 = vrot.slane %v1317_v50, %v1322_v44 }
0x18b1   :  { %v1329_v52 = vsel %vm1328_vm5, %v1327_v32, %v1323_v51  ;;  %v1516_v32 = vld [vmem:[#allocation2 + $0x130] sm:$0xff] }
0x18b2   :  { %v1332_v53 = vsel %vm1331_vm6, %v1329_v52, -inf }
0x18b3   :  { %1333 = vmax.xlane.f32.xlu0 %v1332_v53  ;;  %v1518_v53 = vld [vmem:[#allocation2 + $0x140] sm:$0xff] }
0x1940   :  { %v1334_v36 = vpop.xlane.xlu0 %1333 }
0x1941   :  { %v1339_v56 = vrot.slane %v1334_v36, %v1302_v34  ;;  %v1343_v57 = vrot.slane %v1334_v36, %v1342_v55  ;;  %v1884_v36 = vld [vmem:[#allocation2 + $0x15e] ss:$0 sm:$0xff] }
0x1943   :  { %v1346_v58 = vsub.f32 %v1314_v49, %v1339_v56  ;;  %v1347_v59 = vsub.f32 %v1317_v50, %v1343_v57  ;;  %v1514_v49 = vld [vmem:[#allocation2 + $0x120] sm:$0xff]  ;;  %v1515_v50 = vld [vmem:[#allocation2 + $0x128] sm:$0xff] }
0x1944   :  { %v2287_v52 = vpack.c.bf16 %v1516_v32, %v1515_v50 }
0x1945   :  { %v1348_v60 = vmul.f32 1.442695, %v1346_v58  ;;  %v1350_v42 = vmul.f32 1.442695, %v1347_v59 }
0x1947   :  { %2362 = vpow2.f32 %v1348_v60 }
0x1948   :  { %2364 = vpow2.f32 %v1350_v42 }
0x1951   :  { %v2363_v61 = vpop.eup %2362 }
0x1952   :  { %v2365_v62 = vpop.eup %2364  ;;  %1355 = vperm.xlu1 %2312, %v2363_v61  }
0x1953   :  { %1358 = vperm.xlu0 %2313, %v2365_v62  }
0x19d1   :  { %v1356_v63 = vpop.permute.xlu1 %1355 }
0x19d2   :  { %v1359_v0 = vpop.permute.xlu0 %1358  ;;  %v1363_v3 = vrot.slane %v1356_v63, %v1322_v44  ;;  %v1520_v63 = vld [vmem:[#allocation2 + $0x150] sm:$0xff] }
0x19d3   :  { %v1367_v4 = vrot.slane %v1359_v0, %v1322_v44 }
0x19d5   :  { %v1368_v5 = vsel %vm1328_vm5, %v1367_v4, %v1363_v3  ;;  %v1886_v3 = vld [vmem:[#allocation2 + $0x15f] ss:$0 sm:$0xff] }
0x19d6   :  { %v1370_v6 = vsel %vm1331_vm6, %v1368_v5, 0.0 }
0x19d7   :  { %1371 = vadd.xlane.f32.xlu1 %v1370_v6 }
0x1a64   :  { %v1372_v7 = vpop.xlane.xlu1 %1371 }
0x1a65   :  { %2366 = vrcp.f32 %v1372_v7 }
0x1a6f   :  { %v2367_v8 = vpop.eup %2366 }
0x1a70   :  { %v1378_v9 = vrot.slane %v2367_v8, %v1302_v34  ;;  %v1382_v11 = vrot.slane %v2367_v8, %v1342_v55  ;;  %v1507_v34 = vld [vmem:[#allocation2 + $0xe8] sm:$0xff]  ;;  %v1882_v55 = vld [vmem:[#allocation2 + $0x15d] ss:$0 sm:$0xff] }
0x1a71   :  { %v2275_v37 = vpack.c.bf16 %v1508_v23, %v1507_v34  ;;  %v1593_v56 = vadd.f32 %v1882_v55, %v2629_v18  ;;  %v1888_v18 = vld [vmem:[#allocation2 + $0x160] ss:$0 sm:$0xff] }
0x1a72   :  { %v1385_v10 = vmul.f32 %v2363_v61, %v1378_v9  ;;  %v1386_v12 = vmul.f32 %v2365_v62, %v1382_v11  ;;  %v1519_v62 = vld [vmem:[#allocation2 + $0x148] sm:$0xff] }
0x1a73   :  { %v1596_v60 = vmax.f32 %v1593_v56, 0.0  ;;  %v2293_v0 = vpack.c.bf16 %v1520_v63, %v1519_v62 }
0x1a74   :  { %1398 = vperm.xlu0 %2313, %v1385_v10  }
0x1a78   :  { %1401 = vperm.xlu0 %2313, %v1386_v12  }
0x1af3   :  { %v1399_v1 = vpop.permute.xlu0 %1398 }
0x1af4   :  { %v1406_v25 = vrot.slane %v1399_v1, %v1322_v44  ;;  %v1417_v27 = vrot.slane %v1399_v1, %v1416_v2 }
0x1af7   :  { %v1402_v20 = vpop.permute.xlu0 %1401 }
0x1af8   :  { %v1410_v28 = vrot.slane %v1402_v20, %v1322_v44  ;;  %v1421_v29 = vrot.slane %v1402_v20, %v1416_v2  ;;  %v1513_v44 = vld [vmem:[#allocation2 + $0x118] sm:$0xff] }
0x1af9   :  { %v2284_v51 = vpack.c.bf16 %v1514_v49, %v1513_v44 }
0x1afa   :  { %v1411_v17 = vsel %vm1328_vm5, %v1410_v28, %v1406_v25  ;;  %v1422_v24 = vsel %vm1328_vm5, %v1421_v29, %v1417_v27 }
0x1afb   :  { %v1425_v31 = vsel %vm1424_vm9, %v1411_v17, %v1422_v24 }
0x1afc   :  { %v1426_v35 = vsel %vm1394_vm10, %v1425_v31, 0.0 }
0x1afd   :  { %2126 = vmatmul.mubr.msk.f32.vlgmr.msra.gmra.mrb[10].mxu0 %vm1427_vm11, %v1426_v35 }
0x1afe   :  { %2273 = vmatpush3.bf16.msra.mxu0 %v2272_v30  ;;  %2147 = vmatprep.mubr.msk.f32.mxu0 %vm2422_vm3, %v2420_v26 }
0x1aff   :  { %2274 = vmatprep.subr.bf16.mxu0 %v2421_v33 }
0x1b02   :  { %2276 = vmatpush3.bf16.msra.mxu0 %v2275_v37 }
0x1b03   :  { %2283 = vmatprep.subr.bf16.mxu0 %v2421_v33 }
0x1bd0   :  { %v1497_v38 = vpop.f32.mrb[10].mxu0 }
0x1bd1   :  { %v2127_v39 = vpop.f32.mrb[11].mxu0  ;;  %2148 = vmatmul.mubr.msk.f32.vlgmr.msra.gmra.mrb[12].mxu0 %vm146_vm4, %v1497_v38 }
0x1bd2   :  { %2177 = vmatprep.mubr.msk.f32.mxu0 %vm2422_vm3, %v2420_v26  ;;  %2285 = vmatpush3.bf16.msra.mxu0 %v2284_v51  ;;  %v1517_v26 = vld [vmem:[#allocation2 + $0x138] sm:$0xff] }
0x1bd3   :  { %2286 = vmatprep.subr.bf16.mxu0 %v2421_v33  ;;  %v2290_v54 = vpack.c.bf16 %v1518_v53, %v1517_v26 }
0x1bd6   :  { %2288 = vmatpush3.bf16.msra.mxu0 %v2287_v52 }
0x1bd7   :  { %2289 = vmatprep.subr.bf16.mxu0 %v2421_v33 }
0x1bda   :  { %2291 = vmatpush3.bf16.msra.mxu0 %v2290_v54 }
0x1bdb   :  { %2292 = vmatprep.subr.bf16.mxu0 %v2421_v33 }
0x1bde   :  { %2294 = vmatpush3.bf16.msra.mxu0 %v2293_v0 }
0x1ca4   :  { %v1671_v57 = vpop.f32.mrb[12].mxu0 }
0x1ca5   :  { %v1672_v58 = vadd.f32 %v1884_v36, %v1671_v57  ;;  %v2149_v59 = vpop.f32.mrb[13].mxu0 }
0x1ca7   :  { %v1675_v42 = vmax.f32 %v1672_v58, 0.0 }
0x1ca9   :  { %v1676_v61 = vmul.f32 %v1675_v42, %v1596_v60 }
0x1cab   :  { %2159 = vmatmul.mubr.msk.f32.vlgmr.msra.gmra.mrb[16].mxu1 %vm146_vm4, %v1676_v61 }
0x1d7e   :  { %v1751_v4 = vpop.f32.mrb[16].mxu1 }
0x1d7f   :  { %v1752_v5 = vadd.f32 %v1886_v3, %v1751_v4  ;;  %v2160_v33 = vpop.f32.mrb[17].mxu1 }
0x1d81   :  { %v1755_v6 = vmax.f32 %v1752_v5, 0.0 }
0x1d83   :  { %2178 = vmatmul.mubr.msk.f32.vlgmr.msra.gmra.mrb[14].mxu0 %vm1761_vm12, %v1755_v6 }
0x1e56   :  { %v1831_v7 = vpop.f32.mrb[14].mxu0 }
0x1e57   :  { %v1832_v8 = vadd.f32 %v1888_v18, %v1831_v7  ;;  %v2179_v9 = vpop.f32.mrb[15].mxu0 }
0x1e59   :  { %1836 = vst.msk [vmem:[#allocation5] sm:$0x3] %vm1835_vm13, %v1832_v8 }
0x1e5a   :  { %2401 = shalt.err (!%p2398_p12)
}
0x1e5b   :  { %s2402_s4 = scalar_lea.hbm %s2689_s2, 32 }
0x1e5c   :  { %p2403_p13 = scmp.ne.s32.totalorder %s2689_s2, %s2402_s4  ;;  %p2406_p0 = scmp.lt.u32.totalorder %s2402_s4, %s2689_s2 }
0x1e5e   :  { %p2408_p1 = pnand %p2406_p0, %p2403_p13 }
0x1e60   :  { %2411 = shalt.err (!%p2408_p1)
}
0x1e61   :  { %1846 = dma.vmem_to_hbm [thread:$0]  %s1844_s28, 32, %s2689_s2, [#allocation4]  }
0x1e62   :  { %2414 = dma.done.wait [#allocation4], 32  }
0x1e63   :  { %2415 = vsyncadd [#allocation4], 4294967264 }
0x1e64   :  { %1850 = vsyncpa [#allocation3], 1 }
0x1e65   :  { %1851 = vsyncpa [#allocation4], 1 }

</bundles_post_ra>
